<compile_context>
chip_gen: v7x
topology: tpu7x:2x2x1
jax: 0.10.0
libtpu: 0.0.40
codegen_flags: <defaults>
</compile_context>

<pallas_src>
import functools
import math

import jax
import jax.numpy as jnp
from jax import lax
from jax.experimental import pallas as pl
from jax.experimental.pallas import tpu as pltpu


def _block_kernel(x_ref, w_ref, b_ref, gamma_ref, beta_ref, msame_ref,
                  mask_ref, o_ref, sum_ref, ssq_ref, scale_ref, shift_ref, *,
                  W, T, halo, hw, groups, eps):
    """Fused 3x3 conv + GroupNorm + SiLU for one spatial tile of one sample.

    grid = (sample, pass, tile).  Pass 0 accumulates GroupNorm statistics,
    pass 1 recomputes the conv tile and writes the normalized/activated result.
    """
    p = pl.program_id(1)
    t = pl.program_id(2)
    c_out = o_ref.shape[1]

    # ---- 3x3 conv from the resident, height-halo-padded, flattened sample --
    # centers of this tile live at flat rows [halo + t*T, halo + t*T + T);
    # `base` additionally covers the +-(W+1) halo needed by the 3x3 window.
    start = t * T
    if T % 8 == 0:
        start = pl.multiple_of(start, 8)
    base = x_ref[0, pl.ds(start, T + 2 * halo), :]            # (T+2*halo, Cin)

    acc = jnp.zeros((T, c_out), jnp.float32)
    for dx in (-1, 0, 1):
        part = jnp.zeros((T, c_out), jnp.float32)
        for dy in (-1, 0, 1):
            k = (dy + 1) * 3 + (dx + 1)
            off = halo + dy * W + dx                           # static offset
            part = part + jnp.dot(base[off:off + T, :], w_ref[k],
                                  preferred_element_type=jnp.float32)
        # columns x==0 (dx=-1) / x==W-1 (dx=+1) would wrap across image rows;
        # the true contribution there is zero padding -> mask it out.
        if dx == -1:
            part = part * mask_ref[:, 0:1]
        elif dx == 1:
            part = part * mask_ref[:, 1:2]
        acc = acc + part
    acc = acc + b_ref[...]                                     # conv bias

    # ---- pass 0: accumulate per-channel sum / sum-of-squares ---------------
    @pl.when(jnp.logical_and(p == 0, t == 0))
    def _init():
        sum_ref[...] = jnp.zeros_like(sum_ref)
        ssq_ref[...] = jnp.zeros_like(ssq_ref)

    @pl.when(p == 0)
    def _accumulate():
        sum_ref[...] += jnp.sum(acc, axis=0, keepdims=True)
        ssq_ref[...] += jnp.sum(acc * acc, axis=0, keepdims=True)

    # ---- pass 1, first tile: fold channel stats -> per-channel affine ------
    @pl.when(jnp.logical_and(p == 1, t == 0))
    def _finalize():
        cnt = float(hw * (c_out // groups))
        gsum = jnp.dot(sum_ref[...], msame_ref[...],
                       preferred_element_type=jnp.float32)
        gssq = jnp.dot(ssq_ref[...], msame_ref[...],
                       preferred_element_type=jnp.float32)
        mean = gsum / cnt
        var = gssq / cnt - mean * mean
        rstd = lax.rsqrt(var + eps)
        scale = rstd * gamma_ref[...]
        scale_ref[...] = scale
        shift_ref[...] = beta_ref[...] - mean * scale

    # ---- pass 1: normalize + SiLU, store a lane-dense (Cout, T) tile -------
    @pl.when(p == 1)
    def _store():
        z = acc * scale_ref[...] + shift_ref[...]
        z = z * jax.nn.sigmoid(z)
        o_ref[0] = z.T.astype(o_ref.dtype)


def _pick_tile(hw, w, max_tile):
    """Largest T with T | hw, W | T and 128 | T; falls back to whole sample."""
    if hw <= max_tile:
        return hw
    unit = 128 * w // math.gcd(128, w)          # lcm(128, W)
    best = None
    t = unit
    while t <= max_tile:
        if hw % t == 0:
            best = t
        t += unit
    return best if best is not None else hw


def block_forward(fmap_nchw, params, *, groups=8, eps=1e-5,
                  matmul_dtype=jnp.bfloat16, max_tile=2048):
    """Block(dim_in, dim_out): Conv2d(3x3, pad=1) -> GroupNorm(groups) -> SiLU."""
    w, b, gamma, beta = params                   # w: (Cout, Cin, 3, 3) (OIHW)
    n, c_in, h, wd = fmap_nchw.shape
    c_out = w.shape[0]
    hw = h * wd
    assert c_out % groups == 0, "GroupNorm requires c_out % groups == 0"

    T = _pick_tile(hw, wd, max_tile)             # flattened-pixel tile size
    n_tiles = hw // T
    halo = wd + 1                                # covers the +-(W+1) 3x3 window
    s_pad = hw + 2 * halo

    # NCHW -> flattened channels-last + zero halo rows (single XLA fusion,
    # ~1x the input bytes; no 9x im2col blowup, no output-side transpose).
    x = jnp.transpose(fmap_nchw, (0, 2, 3, 1)).reshape(n, hw, c_in)
    x = jnp.pad(x, ((0, 0), (halo, halo), (0, 0))).astype(matmul_dtype)

    # OIHW -> (9, Cin, Cout): one (Cin, Cout) matrix per 3x3 tap.
    w9 = jnp.transpose(w, (2, 3, 1, 0)).reshape(9, c_in, c_out)
    w9 = w9.astype(matmul_dtype)
    b2 = b.reshape(1, c_out).astype(jnp.float32)
    g2 = gamma.reshape(1, c_out).astype(jnp.float32)
    be2 = beta.reshape(1, c_out).astype(jnp.float32)

    # hoisted GroupNorm / edge constants (computed once, not per grid step)
    grp = jnp.arange(c_out, dtype=jnp.int32) // (c_out // groups)
    m_same = (grp[:, None] == grp[None, :]).astype(jnp.float32)   # (Cout,Cout)
    col = jnp.arange(T, dtype=jnp.int32) % wd
    edge_mask = jnp.stack([(col != 0), (col != wd - 1)],
                          axis=1).astype(jnp.float32)             # (T, 2)

    # explicit VMEM budget (valid on v7x 64 MiB; generous on v5e/v6e 128 MiB)
    in_itm = jnp.dtype(matmul_dtype).itemsize
    out_itm = jnp.dtype(fmap_nchw.dtype).itemsize
    cin_l = max(c_in, 128)
    cout_l = max(c_out, 128)
    vmem_need = (2 * s_pad * cin_l * in_itm                 # resident input x2
                 + 2 * ((c_out + 7) // 8) * 8 * max(T, 128) * out_itm  # out x2
                 + (T + 2 * halo) * cin_l * in_itm          # base window value
                 + 6 * T * cout_l * 4                       # acc/part/z values
                 + 9 * 8 * cout_l * in_itm                  # weights
                 + (2 << 20))
    vmem_limit = int(min(max(2 * vmem_need, 16 * 2**20), 64 * 2**20))

    kernel = functools.partial(_block_kernel, W=wd, T=T, halo=halo,
                               hw=hw, groups=groups, eps=eps)

    out = pl.pallas_call(
        kernel,
        out_shape=jax.ShapeDtypeStruct((n, c_out, hw), fmap_nchw.dtype),
        grid_spec=pltpu.PrefetchScalarGridSpec(
            num_scalar_prefetch=0,
            grid=(n, 2, n_tiles),                 # (sample, pass, spatial tile)
            in_specs=[
                pl.BlockSpec((1, s_pad, c_in), lambda i, p, t: (i, 0, 0)),
                pl.BlockSpec((9, c_in, c_out), lambda i, p, t: (0, 0, 0)),
                pl.BlockSpec((1, c_out), lambda i, p, t: (0, 0)),
                pl.BlockSpec((1, c_out), lambda i, p, t: (0, 0)),
                pl.BlockSpec((1, c_out), lambda i, p, t: (0, 0)),
                pl.BlockSpec((c_out, c_out), lambda i, p, t: (0, 0)),
                pl.BlockSpec((T, 2), lambda i, p, t: (0, 0)),
            ],
            # pass 0 never writes; map it onto the block pass 1 writes first so
            # no extra HBM write-back happens.
            out_specs=pl.BlockSpec((1, c_out, T), lambda i, p, t: (i, 0, p * t)),
            scratch_shapes=[pltpu.VMEM((1, c_out), jnp.float32)
                            for _ in range(4)],
        ),
        compiler_params=pltpu.CompilerParams(
            dimension_semantics=("parallel", "arbitrary", "arbitrary"),
            vmem_limit_bytes=vmem_limit),
    )(x, w9, b2, g2, be2, m_same, edge_mask)

    return out.reshape(n, c_out, h, wd)          # (N, Cout, HW) is already NCHW


def nearest_resize(img_nchw, target):
    """resize_image_to: nearest-neighbor resize to (target, target)."""
    # TODO(synk): some dalle2-pytorch versions use resize_right (bicubic);
    # nearest-neighbor F.interpolate semantics implemented here.
    n, c, h, w = img_nchw.shape
    if h == target and w == target:
        return img_nchw
    rows = (jnp.arange(target) * h // target).astype(jnp.int32)
    cols = (jnp.arange(target) * w // target).astype(jnp.int32)
    return img_nchw[:, :, rows[:, None], cols[None, :]]


def upsample_combiner_forward(x, fmaps, block_params, *, enabled=True,
                              groups=8, eps=1e-5,
                              matmul_dtype=jnp.bfloat16, max_tile=2048):
    """UpsampleCombiner.forward. x, fmaps are NCHW."""
    target = x.shape[-1]
    fmaps = tuple(fmaps) if fmaps is not None else tuple()
    if (not enabled) or len(fmaps) == 0 or len(block_params) == 0:
        return x
    fmaps = [nearest_resize(f, target) for f in fmaps]
    # TODO(synk): the per-fmap pallas_calls could be fused into one call with a
    # block-diagonal weight, writing each Cout slice of the concatenated output.
    outs = [block_forward(f, p, groups=groups, eps=eps,
                          matmul_dtype=matmul_dtype, max_tile=max_tile)
            for f, p in zip(fmaps, block_params)]
    return jnp.concatenate((x, *outs), axis=1)


def _reference(x, fmaps, params, groups=8, eps=1e-5):
    """Pure-JAX reference (no Pallas) for verification."""
    outs = []
    for f, (w, b, gamma, beta) in zip(fmaps, params):
        y = lax.conv_general_dilated(
            f, w, window_strides=(1, 1), padding=((1, 1), (1, 1)),
            dimension_numbers=("NCHW", "OIHW", "NCHW"))
        y = y + b[None, :, None, None]
        n, c, h, wd = y.shape
        yg = y.reshape(n, groups, c // groups, h, wd)
        mean = yg.mean(axis=(2, 3, 4), keepdims=True)
        var = ((yg - mean) ** 2).mean(axis=(2, 3, 4), keepdims=True)
        yn = ((yg - mean) * lax.rsqrt(var + eps)).reshape(n, c, h, wd)
        z = yn * gamma[None, :, None, None] + beta[None, :, None, None]
        outs.append(z * jax.nn.sigmoid(z))
    return jnp.concatenate((x, *outs), axis=1)


if __name__ == "__main__":
    key = jax.random.PRNGKey(0)

    # UpsampleCombiner(dim=4, enabled=True, dim_ins=(6, 8), dim_outs=(8, 16))
    dim = 4
    dim_ins = (6, 8)
    dim_outs = (8, 16)          # divisible by GroupNorm groups=8
    n, h = 2, 16

    keys = jax.random.split(key, 1 + 4 * len(dim_ins))
    x = jax.random.normal(keys[0], (n, dim, h, h), jnp.float32)

    fmaps, params = [], []
    for i, (d_in, d_out) in enumerate(zip(dim_ins, dim_outs)):
        kf, kw, kb, kg = keys[1 + 4 * i: 1 + 4 * (i + 1)]
        fmaps.append(jax.random.normal(kf, (n, d_in, h, h), jnp.float32))
        w = 0.1 * jax.random.normal(kw, (d_out, d_in, 3, 3), jnp.float32)
        b = 0.05 * jax.random.normal(kb, (d_out,), jnp.float32)
        gamma = 1.0 + 0.1 * jax.random.normal(kg, (d_out,), jnp.float32)
        beta = jnp.zeros((d_out,), jnp.float32)
        params.append((w, b, gamma, beta))

    ref = _reference(x, fmaps, params)

    # default path: bf16 matmuls, single spatial tile (H*W = 256 <= 2048)
    out = jax.block_until_ready(
        upsample_combiner_forward(x, fmaps, params, enabled=True))
    assert out.shape == (n, dim + sum(dim_outs), h, h), out.shape
    err = float(jnp.max(jnp.abs(out - ref)))
    assert err < 3e-2, f"bf16 path max err {err}"

    # f32 matmuls + forced spatial tiling (T=128 -> 2 tiles) exercises the
    # two-pass GroupNorm accumulate / normalize path.
    out32 = jax.block_until_ready(
        upsample_combiner_forward(x, fmaps, params, enabled=True,
                                  matmul_dtype=jnp.float32, max_tile=128))
    err32 = float(jnp.max(jnp.abs(out32 - ref)))
    assert err32 < 2e-3, f"f32 tiled path max err {err32}"

    # disabled / no-fmaps paths return x unchanged
    out_disabled = jax.block_until_ready(
        upsample_combiner_forward(x, fmaps, params, enabled=False))
    assert out_disabled.shape == x.shape
    out_nofmaps = jax.block_until_ready(
        upsample_combiner_forward(x, (), params, enabled=True))
    assert out_nofmaps.shape == x.shape

    print("KERNEL_OK")
</pallas_src>

<mosaic_0001>
module attributes {stable_mosaic.version = 11 : i64} {
  func.func @_block_kernel(%arg0: i32, %arg1: i32, %arg2: i32, %arg3: memref<1x290x6xbf16, #tpu.memory_space<vmem>>, %arg4: memref<9x6x8xbf16, #tpu.memory_space<vmem>>, %arg5: memref<1x8xf32, #tpu.memory_space<vmem>>, %arg6: memref<1x8xf32, #tpu.memory_space<vmem>>, %arg7: memref<1x8xf32, #tpu.memory_space<vmem>>, %arg8: memref<8x8xf32, #tpu.memory_space<vmem>>, %arg9: memref<256x2xf32, #tpu.memory_space<vmem>>, %arg10: memref<1x8x256xf32, #tpu.memory_space<vmem>>, %arg11: memref<1x8xf32, #tpu.memory_space<vmem>>, %arg12: memref<1x8xf32, #tpu.memory_space<vmem>>, %arg13: memref<1x8xf32, #tpu.memory_space<vmem>>, %arg14: memref<1x8xf32, #tpu.memory_space<vmem>>) attributes {dimension_semantics = [#tpu.dimension_semantics<parallel>, #tpu.dimension_semantics<arbitrary>, #tpu.dimension_semantics<arbitrary>], iteration_bounds = array<i64: 2, 2, 1>, scalar_prefetch = 0 : i64, scratch_operands = 4 : i64, tpu.core_type = #tpu.core_type<tc>, window_params = [{transform_indices = @transform_0, window_bounds = array<i64: 1, 290, 6>}, {pipeline_mode = #tpu.pipeline_mode<synchronous>, transform_indices = @transform_1, window_bounds = array<i64: 9, 6, 8>}, {pipeline_mode = #tpu.pipeline_mode<synchronous>, transform_indices = @transform_2, window_bounds = array<i64: 1, 8>}, {pipeline_mode = #tpu.pipeline_mode<synchronous>, transform_indices = @transform_3, window_bounds = array<i64: 1, 8>}, {pipeline_mode = #tpu.pipeline_mode<synchronous>, transform_indices = @transform_4, window_bounds = array<i64: 1, 8>}, {pipeline_mode = #tpu.pipeline_mode<synchronous>, transform_indices = @transform_5, window_bounds = array<i64: 8, 8>}, {pipeline_mode = #tpu.pipeline_mode<synchronous>, transform_indices = @transform_6, window_bounds = array<i64: 256, 2>}, {transform_indices = @transform_7, window_bounds = array<i64: 1, 8, 256>}]} {
    %c256_i32 = arith.constant 256 : i32
    %0 = arith.muli %arg2, %c256_i32 : i32
    %1 = tpu.assume_multiple %0, 8 : i32
    %c0 = arith.constant 0 : index
    %2 = arith.index_cast %1 : i32 to index
    %c0_0 = arith.constant 0 : index
    %3 = vector.load %arg3[%c0, %2, %c0_0] : memref<1x290x6xbf16, #tpu.memory_space<vmem>>, vector<1x290x6xbf16>
    %4 = vector.shape_cast %3 : vector<1x290x6xbf16> to vector<290x6xbf16>
    %cst = arith.constant 0.000000e+00 : f32
    %5 = vector.broadcast %cst : f32 to vector<256x8xf32>
    %cst_1 = arith.constant 0.000000e+00 : f32
    %6 = vector.broadcast %cst_1 : f32 to vector<256x8xf32>
    %7 = vector.extract_strided_slice %4 {offsets = [0, 0], sizes = [256, 6], strides = [1, 1]} : vector<290x6xbf16> to vector<256x6xbf16>
    %c0_2 = arith.constant 0 : index
    %c0_3 = arith.constant 0 : index
    %c0_4 = arith.constant 0 : index
    %8 = vector.load %arg4[%c0_2, %c0_3, %c0_4] : memref<9x6x8xbf16, #tpu.memory_space<vmem>>, vector<1x6x8xbf16>
    %9 = vector.shape_cast %8 : vector<1x6x8xbf16> to vector<6x8xbf16>
    %cst_5 = arith.constant dense<0.000000e+00> : vector<256x8xf32>
    %10 = tpu.matmul %7, %9, %cst_5 {dimension_numbers = #tpu.dot_dimension_numbers<[1], [0], [0], [1], [0, 0, 1, 1], [], []>} : vector<256x6xbf16>, vector<6x8xbf16>, vector<256x8xf32> -> vector<256x8xf32>
    %11 = arith.addf %6, %10 : vector<256x8xf32>
    %12 = vector.extract_strided_slice %4 {offsets = [16, 0], sizes = [256, 6], strides = [1, 1]} : vector<290x6xbf16> to vector<256x6xbf16>
    %c3 = arith.constant 3 : index
    %c0_6 = arith.constant 0 : index
    %c0_7 = arith.constant 0 : index
    %13 = vector.load %arg4[%c3, %c0_6, %c0_7] : memref<9x6x8xbf16, #tpu.memory_space<vmem>>, vector<1x6x8xbf16>
    %14 = vector.shape_cast %13 : vector<1x6x8xbf16> to vector<6x8xbf16>
    %cst_8 = arith.constant dense<0.000000e+00> : vector<256x8xf32>
    %15 = tpu.matmul %12, %14, %cst_8 {dimension_numbers = #tpu.dot_dimension_numbers<[1], [0], [0], [1], [0, 0, 1, 1], [], []>} : vector<256x6xbf16>, vector<6x8xbf16>, vector<256x8xf32> -> vector<256x8xf32>
    %16 = arith.addf %11, %15 : vector<256x8xf32>
    %17 = vector.extract_strided_slice %4 {offsets = [32, 0], sizes = [256, 6], strides = [1, 1]} : vector<290x6xbf16> to vector<256x6xbf16>
    %c6 = arith.constant 6 : index
    %c0_9 = arith.constant 0 : index
    %c0_10 = arith.constant 0 : index
    %18 = vector.load %arg4[%c6, %c0_9, %c0_10] : memref<9x6x8xbf16, #tpu.memory_space<vmem>>, vector<1x6x8xbf16>
    %19 = vector.shape_cast %18 : vector<1x6x8xbf16> to vector<6x8xbf16>
    %cst_11 = arith.constant dense<0.000000e+00> : vector<256x8xf32>
    %20 = tpu.matmul %17, %19, %cst_11 {dimension_numbers = #tpu.dot_dimension_numbers<[1], [0], [0], [1], [0, 0, 1, 1], [], []>} : vector<256x6xbf16>, vector<6x8xbf16>, vector<256x8xf32> -> vector<256x8xf32>
    %21 = arith.addf %16, %20 : vector<256x8xf32>
    %c0_12 = arith.constant 0 : index
    %c0_13 = arith.constant 0 : index
    %22 = vector.load %arg9[%c0_12, %c0_13] : memref<256x2xf32, #tpu.memory_space<vmem>>, vector<256x1xf32>
    %23 = vector.broadcast %22 : vector<256x1xf32> to vector<256x8xf32>
    %24 = arith.mulf %21, %23 : vector<256x8xf32>
    %25 = arith.addf %5, %24 : vector<256x8xf32>
    %cst_14 = arith.constant 0.000000e+00 : f32
    %26 = vector.broadcast %cst_14 : f32 to vector<256x8xf32>
    %27 = vector.extract_strided_slice %4 {offsets = [1, 0], sizes = [256, 6], strides = [1, 1]} : vector<290x6xbf16> to vector<256x6xbf16>
    %c1 = arith.constant 1 : index
    %c0_15 = arith.constant 0 : index
    %c0_16 = arith.constant 0 : index
    %28 = vector.load %arg4[%c1, %c0_15, %c0_16] : memref<9x6x8xbf16, #tpu.memory_space<vmem>>, vector<1x6x8xbf16>
    %29 = vector.shape_cast %28 : vector<1x6x8xbf16> to vector<6x8xbf16>
    %cst_17 = arith.constant dense<0.000000e+00> : vector<256x8xf32>
    %30 = tpu.matmul %27, %29, %cst_17 {dimension_numbers = #tpu.dot_dimension_numbers<[1], [0], [0], [1], [0, 0, 1, 1], [], []>} : vector<256x6xbf16>, vector<6x8xbf16>, vector<256x8xf32> -> vector<256x8xf32>
    %31 = arith.addf %26, %30 : vector<256x8xf32>
    %32 = vector.extract_strided_slice %4 {offsets = [17, 0], sizes = [256, 6], strides = [1, 1]} : vector<290x6xbf16> to vector<256x6xbf16>
    %c4 = arith.constant 4 : index
    %c0_18 = arith.constant 0 : index
    %c0_19 = arith.constant 0 : index
    %33 = vector.load %arg4[%c4, %c0_18, %c0_19] : memref<9x6x8xbf16, #tpu.memory_space<vmem>>, vector<1x6x8xbf16>
    %34 = vector.shape_cast %33 : vector<1x6x8xbf16> to vector<6x8xbf16>
    %cst_20 = arith.constant dense<0.000000e+00> : vector<256x8xf32>
    %35 = tpu.matmul %32, %34, %cst_20 {dimension_numbers = #tpu.dot_dimension_numbers<[1], [0], [0], [1], [0, 0, 1, 1], [], []>} : vector<256x6xbf16>, vector<6x8xbf16>, vector<256x8xf32> -> vector<256x8xf32>
    %36 = arith.addf %31, %35 : vector<256x8xf32>
    %37 = vector.extract_strided_slice %4 {offsets = [33, 0], sizes = [256, 6], strides = [1, 1]} : vector<290x6xbf16> to vector<256x6xbf16>
    %c7 = arith.constant 7 : index
    %c0_21 = arith.constant 0 : index
    %c0_22 = arith.constant 0 : index
    %38 = vector.load %arg4[%c7, %c0_21, %c0_22] : memref<9x6x8xbf16, #tpu.memory_space<vmem>>, vector<1x6x8xbf16>
    %39 = vector.shape_cast %38 : vector<1x6x8xbf16> to vector<6x8xbf16>
    %cst_23 = arith.constant dense<0.000000e+00> : vector<256x8xf32>
    %40 = tpu.matmul %37, %39, %cst_23 {dimension_numbers = #tpu.dot_dimension_numbers<[1], [0], [0], [1], [0, 0, 1, 1], [], []>} : vector<256x6xbf16>, vector<6x8xbf16>, vector<256x8xf32> -> vector<256x8xf32>
    %41 = arith.addf %36, %40 : vector<256x8xf32>
    %42 = arith.addf %25, %41 : vector<256x8xf32>
    %cst_24 = arith.constant 0.000000e+00 : f32
    %43 = vector.broadcast %cst_24 : f32 to vector<256x8xf32>
    %44 = vector.extract_strided_slice %4 {offsets = [2, 0], sizes = [256, 6], strides = [1, 1]} : vector<290x6xbf16> to vector<256x6xbf16>
    %c2 = arith.constant 2 : index
    %c0_25 = arith.constant 0 : index
    %c0_26 = arith.constant 0 : index
    %45 = vector.load %arg4[%c2, %c0_25, %c0_26] : memref<9x6x8xbf16, #tpu.memory_space<vmem>>, vector<1x6x8xbf16>
    %46 = vector.shape_cast %45 : vector<1x6x8xbf16> to vector<6x8xbf16>
    %cst_27 = arith.constant dense<0.000000e+00> : vector<256x8xf32>
    %47 = tpu.matmul %44, %46, %cst_27 {dimension_numbers = #tpu.dot_dimension_numbers<[1], [0], [0], [1], [0, 0, 1, 1], [], []>} : vector<256x6xbf16>, vector<6x8xbf16>, vector<256x8xf32> -> vector<256x8xf32>
    %48 = arith.addf %43, %47 : vector<256x8xf32>
    %49 = vector.extract_strided_slice %4 {offsets = [18, 0], sizes = [256, 6], strides = [1, 1]} : vector<290x6xbf16> to vector<256x6xbf16>
    %c5 = arith.constant 5 : index
    %c0_28 = arith.constant 0 : index
    %c0_29 = arith.constant 0 : index
    %50 = vector.load %arg4[%c5, %c0_28, %c0_29] : memref<9x6x8xbf16, #tpu.memory_space<vmem>>, vector<1x6x8xbf16>
    %51 = vector.shape_cast %50 : vector<1x6x8xbf16> to vector<6x8xbf16>
    %cst_30 = arith.constant dense<0.000000e+00> : vector<256x8xf32>
    %52 = tpu.matmul %49, %51, %cst_30 {dimension_numbers = #tpu.dot_dimension_numbers<[1], [0], [0], [1], [0, 0, 1, 1], [], []>} : vector<256x6xbf16>, vector<6x8xbf16>, vector<256x8xf32> -> vector<256x8xf32>
    %53 = arith.addf %48, %52 : vector<256x8xf32>
    %54 = vector.extract_strided_slice %4 {offsets = [34, 0], sizes = [256, 6], strides = [1, 1]} : vector<290x6xbf16> to vector<256x6xbf16>
    %c8 = arith.constant 8 : index
    %c0_31 = arith.constant 0 : index
    %c0_32 = arith.constant 0 : index
    %55 = vector.load %arg4[%c8, %c0_31, %c0_32] : memref<9x6x8xbf16, #tpu.memory_space<vmem>>, vector<1x6x8xbf16>
    %56 = vector.shape_cast %55 : vector<1x6x8xbf16> to vector<6x8xbf16>
    %cst_33 = arith.constant dense<0.000000e+00> : vector<256x8xf32>
    %57 = tpu.matmul %54, %56, %cst_33 {dimension_numbers = #tpu.dot_dimension_numbers<[1], [0], [0], [1], [0, 0, 1, 1], [], []>} : vector<256x6xbf16>, vector<6x8xbf16>, vector<256x8xf32> -> vector<256x8xf32>
    %58 = arith.addf %53, %57 : vector<256x8xf32>
    %c0_34 = arith.constant 0 : index
    %c1_35 = arith.constant 1 : index
    %59 = vector.load %arg9[%c0_34, %c1_35] : memref<256x2xf32, #tpu.memory_space<vmem>>, vector<256x1xf32>
    %60 = vector.broadcast %59 : vector<256x1xf32> to vector<256x8xf32>
    %61 = arith.mulf %58, %60 : vector<256x8xf32>
    %62 = arith.addf %42, %61 : vector<256x8xf32>
    %c0_36 = arith.constant 0 : index
    %c0_37 = arith.constant 0 : index
    %63 = vector.load %arg5[%c0_36, %c0_37] : memref<1x8xf32, #tpu.memory_space<vmem>>, vector<1x8xf32>
    %64 = vector.broadcast %63 : vector<1x8xf32> to vector<256x8xf32>
    %65 = arith.addf %62, %64 : vector<256x8xf32>
    %c0_i32 = arith.constant 0 : i32
    %66 = arith.cmpi eq, %arg1, %c0_i32 : i32
    %c0_i32_38 = arith.constant 0 : i32
    %67 = arith.cmpi eq, %arg2, %c0_i32_38 : i32
    %68 = arith.andi %66, %67 : i1
    %69 = arith.extui %68 : i1 to i32
    %c0_i32_39 = arith.constant 0 : i32
    %70 = arith.cmpi ne, %69, %c0_i32_39 : i32
    scf.if %70 {
      %cst_46 = arith.constant 0.000000e+00 : f32
      %82 = vector.broadcast %cst_46 : f32 to vector<1x8xf32>
      %c0_47 = arith.constant 0 : index
      %c0_48 = arith.constant 0 : index
      %83 = vector.load %arg11[%c0_47, %c0_48] : memref<1x8xf32, #tpu.memory_space<vmem>>, vector<1x8xf32>
      tpu.vector_store %arg11[%c0_47, %c0_48], %82 {strides = array<i32>} : memref<1x8xf32, #tpu.memory_space<vmem>>, vector<1x8xf32>,
      %cst_49 = arith.constant 0.000000e+00 : f32
      %84 = vector.broadcast %cst_49 : f32 to vector<1x8xf32>
      %c0_50 = arith.constant 0 : index
      %c0_51 = arith.constant 0 : index
      %85 = vector.load %arg12[%c0_50, %c0_51] : memref<1x8xf32, #tpu.memory_space<vmem>>, vector<1x8xf32>
      tpu.vector_store %arg12[%c0_50, %c0_51], %84 {strides = array<i32>} : memref<1x8xf32, #tpu.memory_space<vmem>>, vector<1x8xf32>,
    } else {
    }
    %c0_i32_40 = arith.constant 0 : i32
    %71 = arith.cmpi eq, %arg1, %c0_i32_40 : i32
    %72 = arith.extui %71 : i1 to i32
    %c0_i32_41 = arith.constant 0 : i32
    %73 = arith.cmpi ne, %72, %c0_i32_41 : i32
    scf.if %73 {
      %c0_46 = arith.constant 0 : index
      %c0_47 = arith.constant 0 : index
      %82 = vector.load %arg11[%c0_46, %c0_47] : memref<1x8xf32, #tpu.memory_space<vmem>>, vector<1x8xf32>
      %cst_48 = arith.constant dense<0.000000e+00> : vector<8xf32>
      %83 = vector.multi_reduction <add>, %65, %cst_48 [0] : vector<256x8xf32> to vector<8xf32>
      %84 = vector.shape_cast %83 : vector<8xf32> to vector<1x8xf32>
      %85 = arith.addf %82, %84 : vector<1x8xf32>
      %c0_49 = arith.constant 0 : index
      %c0_50 = arith.constant 0 : index
      %86 = vector.load %arg11[%c0_49, %c0_50] : memref<1x8xf32, #tpu.memory_space<vmem>>, vector<1x8xf32>
      tpu.vector_store %arg11[%c0_49, %c0_50], %85 {strides = array<i32>} : memref<1x8xf32, #tpu.memory_space<vmem>>, vector<1x8xf32>,
      %c0_51 = arith.constant 0 : index
      %c0_52 = arith.constant 0 : index
      %87 = vector.load %arg12[%c0_51, %c0_52] : memref<1x8xf32, #tpu.memory_space<vmem>>, vector<1x8xf32>
      %88 = arith.mulf %65, %65 : vector<256x8xf32>
      %cst_53 = arith.constant dense<0.000000e+00> : vector<8xf32>
      %89 = vector.multi_reduction <add>, %88, %cst_53 [0] : vector<256x8xf32> to vector<8xf32>
      %90 = vector.shape_cast %89 : vector<8xf32> to vector<1x8xf32>
      %91 = arith.addf %87, %90 : vector<1x8xf32>
      %c0_54 = arith.constant 0 : index
      %c0_55 = arith.constant 0 : index
      %92 = vector.load %arg12[%c0_54, %c0_55] : memref<1x8xf32, #tpu.memory_space<vmem>>, vector<1x8xf32>
      tpu.vector_store %arg12[%c0_54, %c0_55], %91 {strides = array<i32>} : memref<1x8xf32, #tpu.memory_space<vmem>>, vector<1x8xf32>,
    } else {
    }
    %c1_i32 = arith.constant 1 : i32
    %74 = arith.cmpi eq, %arg1, %c1_i32 : i32
    %c0_i32_42 = arith.constant 0 : i32
    %75 = arith.cmpi eq, %arg2, %c0_i32_42 : i32
    %76 = arith.andi %74, %75 : i1
    %77 = arith.extui %76 : i1 to i32
    %c0_i32_43 = arith.constant 0 : i32
    %78 = arith.cmpi ne, %77, %c0_i32_43 : i32
    scf.if %78 {
      %c0_46 = arith.constant 0 : index
      %c0_47 = arith.constant 0 : index
      %82 = vector.load %arg11[%c0_46, %c0_47] : memref<1x8xf32, #tpu.memory_space<vmem>>, vector<1x8xf32>
      %c0_48 = arith.constant 0 : index
      %c0_49 = arith.constant 0 : index
      %83 = vector.load %arg8[%c0_48, %c0_49] : memref<8x8xf32, #tpu.memory_space<vmem>>, vector<8x8xf32>
      %cst_50 = arith.constant dense<0.000000e+00> : vector<1x8xf32>
      %84 = tpu.matmul %82, %83, %cst_50 {dimension_numbers = #tpu.dot_dimension_numbers<[1], [0], [0], [1], [0, 0, 1, 1], [], []>} : vector<1x8xf32>, vector<8x8xf32>, vector<1x8xf32> -> vector<1x8xf32>
      %c0_51 = arith.constant 0 : index
      %c0_52 = arith.constant 0 : index
      %85 = vector.load %arg12[%c0_51, %c0_52] : memref<1x8xf32, #tpu.memory_space<vmem>>, vector<1x8xf32>
      %c0_53 = arith.constant 0 : index
      %c0_54 = arith.constant 0 : index
      %86 = vector.load %arg8[%c0_53, %c0_54] : memref<8x8xf32, #tpu.memory_space<vmem>>, vector<8x8xf32>
      %cst_55 = arith.constant dense<0.000000e+00> : vector<1x8xf32>
      %87 = tpu.matmul %85, %86, %cst_55 {dimension_numbers = #tpu.dot_dimension_numbers<[1], [0], [0], [1], [0, 0, 1, 1], [], []>} : vector<1x8xf32>, vector<8x8xf32>, vector<1x8xf32> -> vector<1x8xf32>
      %cst_56 = arith.constant 2.560000e+02 : f32
      %88 = vector.broadcast %cst_56 : f32 to vector<1x8xf32>
      %89 = arith.divf %84, %88 : vector<1x8xf32>
      %cst_57 = arith.constant 2.560000e+02 : f32
      %90 = vector.broadcast %cst_57 : f32 to vector<1x8xf32>
      %91 = arith.divf %87, %90 : vector<1x8xf32>
      %92 = arith.mulf %89, %89 : vector<1x8xf32>
      %93 = arith.subf %91, %92 : vector<1x8xf32>
      %cst_58 = arith.constant 9.99999974E-6 : f32
      %94 = vector.broadcast %cst_58 : f32 to vector<1x8xf32>
      %95 = arith.addf %93, %94 : vector<1x8xf32>
      %96 = math.rsqrt %95 : vector<1x8xf32>
      %c0_59 = arith.constant 0 : index
      %c0_60 = arith.constant 0 : index
      %97 = vector.load %arg6[%c0_59, %c0_60] : memref<1x8xf32, #tpu.memory_space<vmem>>, vector<1x8xf32>
      %98 = arith.mulf %96, %97 : vector<1x8xf32>
      %c0_61 = arith.constant 0 : index
      %c0_62 = arith.constant 0 : index
      %99 = vector.load %arg13[%c0_61, %c0_62] : memref<1x8xf32, #tpu.memory_space<vmem>>, vector<1x8xf32>
      tpu.vector_store %arg13[%c0_61, %c0_62], %98 {strides = array<i32>} : memref<1x8xf32, #tpu.memory_space<vmem>>, vector<1x8xf32>,
      %c0_63 = arith.constant 0 : index
      %c0_64 = arith.constant 0 : index
      %100 = vector.load %arg7[%c0_63, %c0_64] : memref<1x8xf32, #tpu.memory_space<vmem>>, vector<1x8xf32>
      %101 = arith.mulf %89, %98 : vector<1x8xf32>
      %102 = arith.subf %100, %101 : vector<1x8xf32>
      %c0_65 = arith.constant 0 : index
      %c0_66 = arith.constant 0 : index
      %103 = vector.load %arg14[%c0_65, %c0_66] : memref<1x8xf32, #tpu.memory_space<vmem>>, vector<1x8xf32>
      tpu.vector_store %arg14[%c0_65, %c0_66], %102 {strides = array<i32>} : memref<1x8xf32, #tpu.memory_space<vmem>>, vector<1x8xf32>,
    } else {
    }
    %c1_i32_44 = arith.constant 1 : i32
    %79 = arith.cmpi eq, %arg1, %c1_i32_44 : i32
    %80 = arith.extui %79 : i1 to i32
    %c0_i32_45 = arith.constant 0 : i32
    %81 = arith.cmpi ne, %80, %c0_i32_45 : i32
    scf.if %81 {
      %c0_46 = arith.constant 0 : index
      %c0_47 = arith.constant 0 : index
      %82 = vector.load %arg13[%c0_46, %c0_47] : memref<1x8xf32, #tpu.memory_space<vmem>>, vector<1x8xf32>
      %83 = vector.broadcast %82 : vector<1x8xf32> to vector<256x8xf32>
      %84 = arith.mulf %65, %83 : vector<256x8xf32>
      %c0_48 = arith.constant 0 : index
      %c0_49 = arith.constant 0 : index
      %85 = vector.load %arg14[%c0_48, %c0_49] : memref<1x8xf32, #tpu.memory_space<vmem>>, vector<1x8xf32>
      %86 = vector.broadcast %85 : vector<1x8xf32> to vector<256x8xf32>
      %87 = arith.addf %84, %86 : vector<256x8xf32>
      %88 = arith.negf %87 : vector<256x8xf32>
      %89 = math.exp %88 : vector<256x8xf32>
      %cst_50 = arith.constant 1.000000e+00 : f32
      %90 = vector.broadcast %cst_50 : f32 to vector<256x8xf32>
      %91 = arith.addf %90, %89 : vector<256x8xf32>
      %92 = arith.divf %90, %91 : vector<256x8xf32>
      %93 = arith.mulf %87, %92 : vector<256x8xf32>
      %94 = tpu.transpose %93, [1, 0] : vector<256x8xf32> -> vector<8x256xf32>
      %c0_51 = arith.constant 0 : index
      %c0_52 = arith.constant 0 : index
      %c0_53 = arith.constant 0 : index
      %95 = vector.load %arg10[%c0_51, %c0_52, %c0_53] : memref<1x8x256xf32, #tpu.memory_space<vmem>>, vector<1x8x256xf32>
      %96 = vector.shape_cast %95 : vector<1x8x256xf32> to vector<8x256xf32>
      %97 = vector.shape_cast %94 : vector<8x256xf32> to vector<1x8x256xf32>
      tpu.vector_store %arg10[%c0_51, %c0_52, %c0_53], %97 {strides = array<i32>} : memref<1x8x256xf32, #tpu.memory_space<vmem>>, vector<1x8x256xf32>,
    } else {
    }
    return
  }
  func.func @transform_0(%arg0: i32, %arg1: i32, %arg2: i32) -> (i32, i32, i32) {
    %c0_i32 = arith.constant 0 : i32
    %c0_i32_0 = arith.constant 0 : i32
    %c0_i32_1 = arith.constant 0 : i32
    return %arg0, %c0_i32, %c0_i32_0 : i32, i32, i32
  }
  func.func @transform_1(%arg0: i32, %arg1: i32, %arg2: i32) -> (i32, i32, i32) {
    %c0_i32 = arith.constant 0 : i32
    %c0_i32_0 = arith.constant 0 : i32
    %c0_i32_1 = arith.constant 0 : i32
    %c0_i32_2 = arith.constant 0 : i32
    return %c0_i32, %c0_i32_0, %c0_i32_1 : i32, i32, i32
  }
  func.func @transform_2(%arg0: i32, %arg1: i32, %arg2: i32) -> (i32, i32) {
    %c0_i32 = arith.constant 0 : i32
    %c0_i32_0 = arith.constant 0 : i32
    %c0_i32_1 = arith.constant 0 : i32
    return %c0_i32, %c0_i32_0 : i32, i32
  }
  func.func @transform_3(%arg0: i32, %arg1: i32, %arg2: i32) -> (i32, i32) {
    %c0_i32 = arith.constant 0 : i32
    %c0_i32_0 = arith.constant 0 : i32
    %c0_i32_1 = arith.constant 0 : i32
    return %c0_i32, %c0_i32_0 : i32, i32
  }
  func.func @transform_4(%arg0: i32, %arg1: i32, %arg2: i32) -> (i32, i32) {
    %c0_i32 = arith.constant 0 : i32
    %c0_i32_0 = arith.constant 0 : i32
    %c0_i32_1 = arith.constant 0 : i32
    return %c0_i32, %c0_i32_0 : i32, i32
  }
  func.func @transform_5(%arg0: i32, %arg1: i32, %arg2: i32) -> (i32, i32) {
    %c0_i32 = arith.constant 0 : i32
    %c0_i32_0 = arith.constant 0 : i32
    %c0_i32_1 = arith.constant 0 : i32
    return %c0_i32, %c0_i32_0 : i32, i32
  }
  func.func @transform_6(%arg0: i32, %arg1: i32, %arg2: i32) -> (i32, i32) {
    %c0_i32 = arith.constant 0 : i32
    %c0_i32_0 = arith.constant 0 : i32
    %c0_i32_1 = arith.constant 0 : i32
    return %c0_i32, %c0_i32_0 : i32, i32
  }
  func.func @transform_7(%arg0: i32, %arg1: i32, %arg2: i32) -> (i32, i32, i32) {
    %0 = arith.muli %arg1, %arg2 : i32
    %c0_i32 = arith.constant 0 : i32
    %c0_i32_0 = arith.constant 0 : i32
    return %arg0, %c0_i32, %0 : i32, i32, i32
  }
}

</mosaic_0001>

<bundles_post_ra>
// kernel: tpu_custom_call.1
= control target key start
LH: loop header
LB: loop body
LE: loop exit
PB: predicated region body
PF: predicated region fallthrough
CT: control target
= control target key end

     0   :  { %12 = vsyncpa [#allocation7], 0  ;;  %s6728_s0 = inlined_call_operand.vmem [shape: bf16[2,290,6], index: 0, kind: input, shape index: {}]   ;;  %s6729_s1 = inlined_call_operand.vmem [shape: bf16[9,6,8], index: 1, kind: input, shape index: {}]   ;;  %s6730_s2 = inlined_call_operand.vmem [shape: f32[1,8], index: 2, kind: input, shape index: {}]   ;;  %s6731_s3 = inlined_call_operand.vmem [shape: f32[1,8], index: 3, kind: input, shape index: {}]   ;;  %s6732_s4 = inlined_call_operand.vmem [shape: f32[1,8], index: 4, kind: input, shape index: {}]   ;;  %s6733_s5 = inlined_call_operand.vmem [shape: f32[8,8], index: 5, kind: input, shape index: {}]   ;;  %s6734_s6 = inlined_call_operand.vmem [shape: f32[256,2], index: 6, kind: input, shape index: {}]   ;;  %s6735_s7 = inlined_call_operand.hbm [shape: f32[2,8,256], index: 7, kind: output, shape index: {}]  }
   0x1   :  { %14 = vsyncpa [#allocation7 + $0x1], 0  ;;  %s5014_s24 = smov 0   ;;  %s5016_s25 = smov 0  }
   0x2   :  { %s5018_s26 = smov 0   ;;  %s5020_s27 = smov 0  }
   0x3   :  { %s5022_s28 = smov 0   ;;  %s5024_s29 = smov 0  }
   0x4   :  { %s5026_s30 = smov 0   ;;  %s5028_s8 = smov 0  }
   0x5 LB: > { %s3734_s9 = sadd.s32 4294967295, %s4966_s8   ;;  %s3735_s10 = sadd.s32 4294967294, %s4966_s8   ;;  %s4966_s8 = sphi %s5028_s8, %s20_s8   ;;  %s4962_s30 = sphi %s5026_s30, %s6861_s30   ;;  %s4958_s29 = sphi %s5024_s29, %s6860_s29   ;;  %s4954_s28 = sphi %s5022_s28, %s6859_s28   ;;  %s4950_s27 = sphi %s5020_s27, %s6858_s27   ;;  %s4946_s26 = sphi %s5018_s26, %s6857_s26   ;;  %s4942_s25 = sphi %s5016_s25, %s6856_s25   ;;  %s4938_s24 = sphi %s5014_s24, %s6855_s24  }
   0x6   : > { %s35_s11 = sadd.s32 1, %s4958_s29  ;;  %s39_s12 = sadd.s32 1, %s4962_s30 }
   0x7   : > { %p37_p0 = scmp.ge.s32.totalorder %s35_s11, 2  ;;  %p212_p1 = scmp.ne.s32.totalorder %s4946_s26, %s4942_s25 }
   0x8   : > { %p213_p2 = scmp.eq.s32.totalorder %s3734_s9, 3  ;;  %p218_p4 = scmp.ne.s32.totalorder %s4942_s25, %s4938_s24 }
   0x9   : > { %s6863_s11 = smov (%p37_p0, %s35_s11), 0  ;;  %s6865_s12 = smov (!%p37_p0, %s39_s12), %s4962_s30 }
   0xa   : > { %p5063_p3 = por %p213_p2, %p212_p1  ;;  %p41_p5 = scmp.ge.s32.totalorder %s6865_s12, 2 }
   0xb   : > { %p219_p6 = scmp.eq.s32.totalorder %s3735_s10, 3  ;;  %p3738_p7 = scmp.ge.s32.totalorder %s4966_s8, 1 }
   0xc   : > { %p263_p8 = scmp.lt.s32.totalorder %s4966_s8, 5  ;;  %s6867_s12 = smov (%p41_p5, %s6865_s12), 0 }
   0xd   : > { %6756 = sst [smem:[#allocation9_spill]] %s6867_s12  ;;  %p5073_p9 = por %p219_p6, %p218_p4 }
   0xe   : > { %p264_p10 = pnand %p3738_p7, %p263_p8  ;;  %s197_s15 = ssub.s32 %s4962_s30, %s6867_s12 }
   0xf   : > { %s202_s16 = sadd.s32 1, %s4946_s26  ;;  %p200_p11 = scmp.eq.s32.totalorder %s197_s15, 0 }
  0x10   : > { %267 = sbr.rel (%p264_p10) target bundleno = 1059 (0x423), region = 48 }
  0x11   : > { %s5081_s17 = scalar_select %p200_p11, %s4946_s26, %s202_s16  }
  0x17   : > { %s6736_s18 = sand.u32 1, %s4942_s25   ;;  %v3741_v0 = vld [vmem:[%s6729_s1 + $0xc] sm:$0x7]  ;;  %vm477_vm0 = vcmask 1042432   ;;  %v345_v1 = vld [vmem:[%s6729_s1] sm:$0x7] }
  0x18   : > { %s5092_s23 = sshll.u32 %s6736_s18, 4  ;;  %4630 = vmatprep.subr.msk.bf16.mxu1 %vm477_vm0, %v3741_v0  ;;  %4631 = vmatprep.subr.msk.bf16.mxu0 %vm477_vm0, %v345_v1  ;;  %v479_v2 = vsel %vm477_vm0, %v3741_v0, 0  ;;  %v651_v3 = vsel %vm477_vm0, %v345_v1, 0  ;;  %p295_p12 = scmp.lt.s32.totalorder %s4954_s28, 1  ;;  %v3791_v4 = vld [vmem:[%s6729_s1 + $0x18] sm:$0x7] }
  0x19   : > { %4121 = vmatpush3.bf16.msra.mxu1 %v479_v2  ;;  %4155 = vmatpush3.bf16.msra.mxu0 %v651_v3  ;;  %v5108_v5 = vld [vmem:[%s6734_s6] sm:$0xff]  ;;  %v4968_v6 = vmov 0   ;;  %v5113_v7 = vld [vmem:[%s6734_s6 + $0x10] sm:$0xff]  ;;  %v5120_v8 = vld [vmem:[%s6734_s6 + $0x8] sm:$0xff]  ;;  %vm428_vm1 = vcmask 48128   ;;  %v825_v12 = vsel %vm477_vm0, %v3791_v4, 0 }
  0x1a   : > { %s296_s15 = scalar_select %p295_p12, %s4954_s28, 1  ;;  %4632 = vmatprep.subr.msk.bf16.mxu1 %vm477_vm0, %v345_v1  ;;  %4633 = vmatprep.subr.msk.bf16.mxu0 %vm477_vm0, %v3791_v4  ;;  %v5125_v9 = vld [vmem:[%s6734_s6 + $0x18] sm:$0xff]  ;;  %vm1281_vm2 = vsmask.f32 7424  ;;  %v3864_v14 = vld [vmem:[%s6729_s1 + $0x14] sm:$0x7] }
  0x1b   : > { %4717 = vset.pattern.permute.xlu0 %v4968_v6  ;;  %4718 = vset.pattern.permute.xlu1 %v4968_v6  ;;  %v5152_v15 = vld [vmem:[%s6729_s1 + $0x10] sm:$0x7]  ;;  %v5169_v20 = vld [vmem:[%s6734_s6 + $0x20] sm:$0xff]  ;;  %v5176_v22 = vld [vmem:[%s6734_s6 + $0x28] sm:$0xff]  ;;  %vm2048_vm3 = vcmask 1046528   ;;  %v5247_v48 = vsel %vm477_vm0, %v3864_v14, 0 }
  0x1c   : > { %s4640_s22 = smul.u32 148, %s296_s15  ;;  %1054 = vperm.xlu0 %4717, %v5108_v5   ;;  %1064 = vperm.xlu1 %4718, %v5113_v7   ;;  %v5204_v33 = vld [vmem:[%s6734_s6 + $0x30] sm:$0xff]  ;;  %v5215_v36 = vld [vmem:[%s6734_s6 + $0x38] sm:$0xff]  ;;  %v5255_v51 = vld [vmem:[%s6734_s6 + $0x40] sm:$0xff]  ;;  %p2907_p13 = scmp.eq.s32.totalorder %s4950_s27, 0 }
  0x1d   : > { %6758 = vst [vmem:[#allocation10_spill] sm:$0xff] %v5215_v36  ;;  %6760 = vst [vmem:[#allocation12_spill] sm:$0xff] %v5255_v51  ;;  %v5260_v52 = vld [vmem:[%s6734_s6 + $0x48] sm:$0xff]  ;;  %v5279_v61 = vld [vmem:[%s6734_s6 + $0x50] sm:$0xff]  ;;  %s6266_s10 = scalar_lea.vmem [#allocation6], %s5092_s23  ;;  %vm2913_vm4 = vcmask (%p2907_p13), 57344  }
  0x1e   : > { %s5130_s20 = scalar_lea.vmem %s6728_s0, %s4640_s22  ;;  %6761 = vst [vmem:[#allocation13_spill] sm:$0xff] %v5260_v52  ;;  %6762 = vst [vmem:[#allocation14_spill] sm:$0xff] %v5279_v61  ;;  %v5284_v62 = vld [vmem:[%s6734_s6 + $0x58] sm:$0xff] }
  0x1f   : > { %v5133_v10 = vld [vmem:[%s5130_s20 + $0x8] sm:$0xff]   ;;  %v5136_v11 = vld [vmem:[%s5130_s20] sm:$0xff]   ;;  %v5144_v13 = vld [vmem:[%s5130_s20 + $0x10] sm:$0xff]   ;;  %6763 = vst [vmem:[#allocation15_spill] sm:$0xff] %v5284_v62 }
  0x20   : > { %1059 = vperm.xlu0 %4717, %v5120_v8   ;;  %1069 = vperm.xlu1 %4718, %v5125_v9   ;;  %v1282_v16 = vshrl.u32 %v5133_v10, 16  ;;  %v5158_v17 = vld [vmem:[%s5130_s20 + $0x18] sm:$0xff]   ;;  %v1284_v18 = vshll.u32 %v5133_v10, 16  ;;  %v1288_v19 = vshll.u32 %v5144_v13, 16  ;;  %v1292_v25 = vshrl.u32 %v5144_v13, 16  ;;  %v5188_v26 = vld [vmem:[%s5130_s20 + $0x20] sm:$0xff]  }
  0x21   : > { %4122 = vmatprep.mubr.msk.bf16.mxu1 %vm428_vm1, %v5133_v10  ;;  %4156 = vmatprep.mubr.msk.bf16.mxu0 %vm428_vm1, %v5136_v11  ;;  %v6738_v27 = vrot.slane %v5133_v10, 1  ;;  %v5194_v28 = vld [vmem:[%s5130_s20 + $0x28] sm:$0xff]   ;;  %v2050_v30 = vrot.slane %v5144_v13, 1  ;;  %v1295_v32 = vshll.u32 %v5158_v17, 16  ;;  %v2052_v35 = vrot.slane %v5158_v17, 1  ;;  %v5237_v44 = vld [vmem:[%s5130_s20 + $0x30] sm:$0xff]  }
  0x22   : > { %4123 = vmatmul.mubr.msk.bf16.vlgmr.msra.gmra.mrb[0].mxu1 %vm428_vm1, %v5144_v13  ;;  %4157 = vmatmul.mubr.msk.bf16.vlgmr.msra.gmra.mrb[0].mxu0 %vm428_vm1, %v5133_v10  ;;  %v5171_v21 = vrot.slane %v1284_v18, 1  ;;  %v1290_v23 = vrot.slane %v1288_v19, 1  ;;  %v1299_v39 = vshrl.u32 %v5158_v17, 16  ;;  %v1302_v41 = vshll.u32 %v5188_v26, 16  ;;  %v5240_v45 = vld [vmem:[%s5130_s20 + $0x80] sm:$0xf] }
  0x23   : > { %4437 = vmatpush3.bf16.msra.mxu1 %v651_v3  ;;  %4189 = vmatpush3.bf16.msra.mxu0 %v825_v12  ;;  %v5209_v34 = vsel %vm2048_vm3, %v6738_v27, %v2050_v30  ;;  %v1297_v37 = vrot.slane %v1295_v32, 1  ;;  %v5226_v38 = vsel %vm2048_vm3, %v2050_v30, %v2052_v35  ;;  %v2054_v43 = vrot.slane %v5188_v26, 1  ;;  %6759 = vst [vmem:[#allocation11_spill] sm:$0xff] %v5240_v45  ;;  %v341_v46 = vld [vmem:[%s5130_s20 + $0x84] sm:$0xf]  ;;  %v5244_v47 = vld [vmem:[%s5130_s20 + $0x38] sm:$0xff]  }
  0x24   : > { %4126 = vmatprep.mubr.msk.bf16.mxu1 %vm428_vm1, %v5158_v17  ;;  %4160 = vmatprep.mubr.msk.bf16.mxu0 %vm428_vm1, %v5144_v13  ;;  %v1287_v24 = vor.u32 %v5171_v21, %v1282_v16  ;;  %v1294_v31 = vor.u32 %v1292_v25, %v1290_v23  ;;  %v1304_v49 = vrot.slane %v1302_v41, 1  ;;  %v5263_v53 = vcombine.low %v5240_v45, %v341_v46  ;;  %v5291_v63 = vld [vmem:[%s5130_s20 + $0x40] sm:$0xff]   ;;  %v5307_v16 = vld [vmem:[%s5130_s20 + $0x48] sm:$0xff]  }
  0x25   : > { %4637 = vmatprep.subr.msk.bf16.mxu0 %vm477_vm0, %v3864_v14  ;;  %4634 = vmatprep.subr.msk.bf16.mxu1 %vm477_vm0, %v5152_v15  ;;  %v1301_v42 = vor.u32 %v1299_v39, %v1297_v37  ;;  %v5250_v50 = vsel %vm2048_vm3, %v2052_v35, %v2054_v43  ;;  %v1306_v54 = vshrl.u32 %v5188_v26, 16  ;;  %v1309_v55 = vshll.u32 %v5194_v28, 16  ;;  %v5323_v35 = vld [vmem:[%s6734_s6 + $0x60] sm:$0xff]  ;;  %v5331_v39 = vld [vmem:[%s5130_s20 + $0x50] sm:$0xff]  }
  0x26   : > { %1074 = vperm.xlu0 %4717, %v5169_v20   ;;  %1079 = vperm.xlu1 %4718, %v5176_v22   ;;  %v5197_v29 = vsel %vm1281_vm2, %v1287_v24, %v1290_v23  ;;  %v5230_v40 = vsel %vm1281_vm2, %v1294_v31, %v1297_v37  ;;  %v2056_v56 = vrot.slane %v5194_v28, 1  ;;  %v1313_v58 = vshrl.u32 %v5194_v28, 16  ;;  %6764 = vst [vmem:[#allocation16_spill] sm:$0xff] %v5323_v35  ;;  %v5328_v37 = vld [vmem:[%s6734_s6 + $0x68] sm:$0xff] }
  0x27   : > { %v5271_v57 = vsel %vm1281_vm2, %v1301_v42, %v1304_v49  ;;  %v1316_v59 = vshll.u32 %v5237_v44, 16  ;;  %v2058_v60 = vrot.slane %v5237_v44, 1  ;;  %v1308_v0 = vor.u32 %v1306_v54, %v1304_v49  ;;  %6765 = vst [vmem:[#allocation17_spill] sm:$0xff] %v5328_v37 }
  0x28   : > { %v1311_v1 = vrot.slane %v1309_v55, 1  ;;  %v5294_v2 = vsel %vm2048_vm3, %v2054_v43, %v2056_v56  ;;  %v1320_v3 = vshrl.u32 %v5237_v44, 16  ;;  %v1323_v12 = vshll.u32 %v5244_v47, 16 }
  0x29   : > { %v1318_v4 = vrot.slane %v1316_v59, 1  ;;  %v5302_v6 = vsel %vm2048_vm3, %v2056_v56, %v2058_v60  ;;  %v2060_v14 = vrot.slane %v5244_v47, 1  ;;  %v1327_v23 = vshrl.u32 %v5244_v47, 16 }
  0x2a   : > { %4127 = vmatmul.mubr.msk.bf16.gmra.mrb[4].mxu1 %vm428_vm1, %v5188_v26  ;;  %4161 = vmatmul.mubr.msk.bf16.gmra.mrb[4].mxu0 %vm428_vm1, %v5158_v17  ;;  %v5310_v18 = vsel %vm1281_vm2, %v1308_v0, %v1311_v1  ;;  %v1315_v19 = vor.u32 %v1313_v58, %v1311_v1  ;;  %v1330_v24 = vshll.u32 %v5291_v63, 16  ;;  %v1325_v30 = vrot.slane %v1323_v12, 1  ;;  %v5346_v58 = vld [vmem:[%s5130_s20 + $0x58] sm:$0xff]  }
  0x2b   : > { %4130 = vmatprep.mubr.msk.bf16.mxu1 %vm428_vm1, %v5194_v28  ;;  %4164 = vmatprep.mubr.msk.bf16.mxu0 %vm428_vm1, %v5188_v26  ;;  %v1322_v25 = vor.u32 %v1320_v3, %v1318_v4  ;;  %v5317_v31 = vsel %vm2048_vm3, %v2058_v60, %v2060_v14  ;;  %v2062_v32 = vrot.slane %v5291_v63, 1  ;;  %v1334_v43 = vshrl.u32 %v5291_v63, 16  ;;  %v5353_v3 = vld [vmem:[%s5130_s20 + $0x60] sm:$0xff]  }
  0x2c   : > { %1084 = vperm.xlu0 %4717, %v5204_v33   ;;  %1089 = vperm.xlu1 %4718, %v5215_v36   ;;  %v5334_v41 = vsel %vm1281_vm2, %v1315_v19, %v1318_v4  ;;  %v1332_v42 = vrot.slane %v1330_v24, 1  ;;  %v1337_v46 = vshll.u32 %v5307_v16, 16  ;;  %v1329_v54 = vor.u32 %v1327_v23, %v1325_v30  ;;  %v5366_v23 = vld [vmem:[%s6734_s6 + $0x70] sm:$0xff]  ;;  %v5371_v24 = vld [vmem:[%s6734_s6 + $0x78] sm:$0xff] }
  0x2d   : > { %v5339_v49 = vsel %vm1281_vm2, %v1322_v25, %v1325_v30  ;;  %v5342_v55 = vsel %vm2048_vm3, %v2060_v14, %v2062_v32  ;;  %v2064_v56 = vrot.slane %v5307_v16, 1  ;;  %v1341_v0 = vshrl.u32 %v5307_v16, 16  ;;  %6766 = vst [vmem:[#allocation18_spill] sm:$0xff] %v5366_v23  ;;  %6767 = vst [vmem:[#allocation19_spill] sm:$0xff] %v5371_v24 }
  0x2e   : > { %v1336_v59 = vor.u32 %v1334_v43, %v1332_v42  ;;  %v1339_v60 = vrot.slane %v1337_v46, 1  ;;  %v1344_v1 = vshll.u32 %v5331_v39, 16  ;;  %v5356_v4 = vsel %vm1281_vm2, %v1329_v54, %v1332_v42  ;;  %v5386_v43 = vld [vmem:[%s5130_s20 + $0x68] sm:$0xff]  }
  0x2f   : > { %v5359_v12 = vsel %vm2048_vm3, %v2062_v32, %v2064_v56  ;;  %v2066_v14 = vrot.slane %v5331_v39, 1  ;;  %v1348_v19 = vshrl.u32 %v5331_v39, 16  ;;  %v1351_v42 = vshll.u32 %v5346_v58, 16 }
  0x30   : > { %1094 = vperm.xlu0 %4717, %v5255_v51   ;;  %1099 = vperm.xlu1 %4718, %v5260_v52   ;;  %v5378_v25 = vsel %vm1281_vm2, %v1336_v59, %v1339_v60  ;;  %v1343_v30 = vor.u32 %v1341_v0, %v1339_v60  ;;  %v1346_v32 = vrot.slane %v1344_v1, 1  ;;  %v2068_v54 = vrot.slane %v5346_v58, 1 }
  0x31   : > { %v5389_v46 = vsel %vm2048_vm3, %v2064_v56, %v2066_v14  ;;  %v1355_v59 = vshrl.u32 %v5346_v58, 16  ;;  %v1358_v60 = vshll.u32 %v5353_v3, 16  ;;  %v1353_v27 = vrot.slane %v1351_v42, 1 }
  0x32   : > { %4131 = vmatmul.mubr.msk.bf16.gmra.mrb[8].mxu1 %vm428_vm1, %v5237_v44  ;;  %4165 = vmatmul.mubr.msk.bf16.gmra.mrb[8].mxu0 %vm428_vm1, %v5194_v28  ;;  %v5395_v0 = vsel %vm1281_vm2, %v1343_v30, %v1346_v32  ;;  %v1350_v1 = vor.u32 %v1348_v19, %v1346_v32  ;;  %v2070_v45 = vrot.slane %v5353_v3, 1  ;;  %v5404_v56 = vsel %vm2048_vm3, %v2066_v14, %v2068_v54  ;;  %v5411_v19 = vld [vmem:[%s6734_s6 + $0x80] sm:$0xff]  ;;  %v5416_v32 = vld [vmem:[%s6734_s6 + $0x88] sm:$0xff] }
  0x33   : > { %4134 = vmatprep.mubr.msk.bf16.mxu1 %vm428_vm1, %v5244_v47  ;;  %4168 = vmatprep.mubr.msk.bf16.mxu0 %vm428_vm1, %v5237_v44  ;;  %v1365_v30 = vshll.u32 %v5386_v43, 16  ;;  %6768 = vst [vmem:[#allocation20_spill] sm:$0xff] %v5411_v19  ;;  %6769 = vst [vmem:[#allocation21_spill] sm:$0xff] %v5416_v32  ;;  %v1357_v14 = vor.u32 %v1355_v59, %v1353_v27  ;;  %v1369_v52 = vshrl.u32 %v5386_v43, 16 }
  0x34   : > { %1104 = vperm.xlu0 %4717, %v5279_v61   ;;  %1109 = vperm.xlu1 %4718, %v5284_v62   ;;  %v5419_v42 = vsel %vm1281_vm2, %v1350_v1, %v1353_v27 }
  0x35   : > { %v1367_v61 = vrot.slane %v1365_v30, 1 }
  0x38   : > { %1114 = vperm.xlu0 %4717, %v5323_v35   ;;  %1119 = vperm.xlu1 %4718, %v5328_v37   ;;  %v1360_v37 = vrot.slane %v1358_v60, 1  ;;  %v1362_v35 = vshrl.u32 %v5353_v3, 16  ;;  %v5422_v60 = vsel %vm2048_vm3, %v2068_v54, %v2070_v45 }
  0x3a   : > { %4135 = vmatmul.mubr.msk.bf16.gmra.mrb[12].mxu1 %vm428_vm1, %v5291_v63  ;;  %4169 = vmatmul.mubr.msk.bf16.gmra.mrb[12].mxu0 %vm428_vm1, %v5244_v47  ;;  %v1364_v62 = vor.u32 %v1362_v35, %v1360_v37  ;;  %v5431_v36 = vsel %vm1281_vm2, %v1357_v14, %v1360_v37  ;;  %v5443_v35 = vld [vmem:[%s6729_s1 + $0x8] sm:$0x7]  ;;  %v1371_v37 = vor.u32 %v1369_v52, %v1367_v61  ;;  %v1386_v52 = vshll.u32 %v5263_v53, 16 }
  0x3b   : > { %4138 = vmatprep.mubr.msk.bf16.mxu1 %vm428_vm1, %v5307_v16  ;;  %4190 = vmatprep.mubr.msk.bf16.mxu0 %vm428_vm1, %v5144_v13  ;;  %v5401_v13 = vld [vmem:[%s5130_s20 + $0x70] sm:$0xff]  }
  0x3c   : > { %1124 = vperm.xlu0 %4717, %v5366_v23   ;;  %1129 = vperm.xlu1 %4718, %v5371_v24   ;;  %v2072_v24 = vrot.slane %v5386_v43, 1  ;;  %v5426_v23 = vld [vmem:[%s5130_s20 + $0x78] sm:$0xff]   ;;  %v1372_v51 = vshll.u32 %v5401_v13, 16  ;;  %v2074_v27 = vrot.slane %v5401_v13, 1  ;;  %v1376_v54 = vshrl.u32 %v5401_v13, 16 }
  0x3d   : > { %v5446_v59 = vsel %vm1281_vm2, %v1364_v62, %v1367_v61  ;;  %v5462_v62 = vld [vmem:[%s6734_s6 + $0x90] sm:$0xff]  ;;  %v5469_v61 = vld [vmem:[%s6734_s6 + $0x98] sm:$0xff] }
  0x3e   : > { %v5434_v1 = vsel %vm2048_vm3, %v2070_v45, %v2072_v24  ;;  %v1374_v30 = vrot.slane %v1372_v51, 1  ;;  %v1379_v45 = vshll.u32 %v5426_v23, 16  ;;  %v5454_v14 = vsel %vm2048_vm3, %v2072_v24, %v2074_v27 }
  0x3f   : > { %6770 = vst [vmem:[#allocation22_spill] sm:$0xff] %v5434_v1  ;;  %6771 = vst [vmem:[#allocation23_spill] sm:$0xff] %v5454_v14  ;;  %v1383_v51 = vshrl.u32 %v5426_v23, 16  ;;  %v5485_v1 = vrot.slane %v1386_v52, 1  ;;  %v6773_v52 = vrot.slane %v5133_v10, 1 }
  0x40   : > { %1134 = vperm.xlu0 %4717, %v5411_v19   ;;  %1139 = vperm.xlu1 %4718, %v5416_v32   ;;  %v5457_v32 = vrot.slane %v5426_v23, 1  ;;  %v1378_v24 = vor.u32 %v1376_v54, %v1374_v30  ;;  %v1381_v19 = vrot.slane %v1379_v45, 1  ;;  %v1611_v54 = vshrl.u32 %v5136_v11, 16 }
  0x41   : > { %v2294_v45 = vrot.slane %v5136_v11, 1 }
  0x42   : > { %4139 = vmatmul.mubr.msk.bf16.gmra.mrb[16].mxu1 %vm428_vm1, %v5331_v39  ;;  %4191 = vmatmul.mubr.msk.bf16.vlgmr.msra.gmra.mrb[0].mxu0 %vm428_vm1, %v5158_v17  ;;  %v5475_v17 = vsel %vm1281_vm2, %v1371_v37, %v1374_v30  ;;  %v5483_v14 = vsel %vm2048_vm3, %v2074_v27, %v5457_v32  ;;  %v5491_v37 = vor.u32 %v1383_v51, %v1381_v19  ;;  %v5502_v27 = vld [vmem:[%s6734_s6 + $0xa8] sm:$0xff]  ;;  %v1613_v30 = vshll.u32 %v5136_v11, 16  ;;  %v5526_v11 = vld [vmem:[%s6734_s6 + $0xb0] sm:$0xff] }
  0x43   : > { %4325 = vmatpush3.bf16.msra.mxu0 %v5247_v48  ;;  %4142 = vmatprep.mubr.msk.bf16.mxu1 %vm428_vm1, %v5346_v58  ;;  %v5488_v48 = vsel %vm1281_vm2, %v1378_v24, %v1381_v19  ;;  %v5517_v24 = vsel %vm2048_vm3, %v2294_v45, %v6773_v52  ;;  %v5583_v45 = vld [vmem:[%s6734_s6 + $0xe8] sm:$0xff]  ;;  %v5599_v52 = vld [vmem:[%s6734_s6 + $0xf8] sm:$0xff] }
  0x44   : > { %4194 = vmatprep.mubr.msk.bf16.mxu0 %vm428_vm1, %v5188_v26  ;;  %4638 = vmatprep.subr.msk.bf16.mxu0 %vm477_vm0, %v5443_v35  ;;  %6772 = vst [vmem:[#allocation24_spill] sm:$0xff] %v5491_v37  ;;  %v5497_v26 = vld [vmem:[%s6734_s6 + $0xa0] sm:$0xff]  ;;  %v5509_v19 = vsel %vm1281_vm2, %v5491_v37, %v5485_v1  ;;  %v1615_v51 = vrot.slane %v1613_v30, 1  ;;  %v5531_v37 = vld [vmem:[%s6734_s6 + $0xb8] sm:$0xff]  ;;  %6774 = vst [vmem:[#allocation25_spill] sm:$0xff] %v5583_v45 }
  0x45   : > { %1144 = vperm.xlu0 %4717, %v5462_v62   ;;  %1149 = vperm.xlu1 %4718, %v5469_v61  }
  0x46   : > { %v1616_v30 = vor.u32 %v1615_v51, %v1611_v54  ;;  %v5551_v54 = vld [vmem:[%s6734_s6 + $0xc8] sm:$0xff]  ;;  %v5594_v51 = vld [vmem:[%s6734_s6 + $0xf0] sm:$0xff] }
  0x48   : > { %v5539_v10 = vsel %vm1281_vm2, %v1616_v30, %v5171_v21  ;;  %v5562_v21 = vld [vmem:[%s6734_s6 + $0xd0] sm:$0xff]  ;;  %v1447_v30 = vsel %vm477_vm0, %v5152_v15, 0  ;;  %v342_v15 = vld [vmem:[%s5130_s20 + $0x88] sm:$0xf] }
  0x49   : > { %1154 = vperm.xlu0 %4717, %v5497_v26   ;;  %1159 = vperm.xlu1 %4718, %v5502_v27  }
  0x4a   : > { %4143 = vmatmul.mubr.msk.bf16.gmra.mrb[20].mxu1 %vm428_vm1, %v5353_v3  ;;  %4195 = vmatmul.mubr.msk.bf16.gmra.mrb[4].mxu0 %vm428_vm1, %v5194_v28  ;;  %v5546_v28 = vld [vmem:[%s6734_s6 + $0xc0] sm:$0xff] }
  0x4b   : > { %4146 = vmatprep.mubr.msk.bf16.mxu1 %vm428_vm1, %v5386_v43  ;;  %4198 = vmatprep.mubr.msk.bf16.mxu0 %vm428_vm1, %v5237_v44  ;;  %v5567_v44 = vld [vmem:[%s6734_s6 + $0xd8] sm:$0xff] }
  0x4d   : > { %1164 = vperm.xlu0 %4717, %v5526_v11   ;;  %1169 = vperm.xlu1 %4718, %v5531_v37  }
  0x51   : > { %1174 = vperm.xlu0 %4717, %v5546_v28   ;;  %1179 = vperm.xlu1 %4718, %v5551_v54  }
  0x52   : > { %4147 = vmatmul.mubr.msk.bf16.gmra.mrb[24].mxu1 %vm428_vm1, %v5401_v13  ;;  %4199 = vmatmul.mubr.msk.bf16.gmra.mrb[8].mxu0 %vm428_vm1, %v5244_v47  ;;  %v5578_v47 = vld [vmem:[%s6734_s6 + $0xe0] sm:$0xff] }
  0x53   : > { %4150 = vmatprep.mubr.msk.bf16.mxu1 %vm428_vm1, %v5426_v23  ;;  %4202 = vmatprep.mubr.msk.bf16.mxu0 %vm428_vm1, %v5291_v63 }
  0x55   : > { %1184 = vperm.xlu0 %4717, %v5562_v21   ;;  %1189 = vperm.xlu1 %4718, %v5567_v44  }
  0x59   : > { %1194 = vperm.xlu0 %4717, %v5578_v47   ;;  %1199 = vperm.xlu1 %4718, %v5583_v45   ;;  %v3809_v45 = vld [vmem:[%s6729_s1 + $0x4] sm:$0x7] }
  0x5a   : > { %4151 = vmatmul.mubr.msk.bf16.gmra.mrb[28].mxu1 %vm428_vm1, %v5263_v53  ;;  %4203 = vmatmul.mubr.msk.bf16.gmra.mrb[12].mxu0 %vm428_vm1, %v5307_v16 }
  0x5b   : > { %4172 = vmatprep.mubr.msk.bf16.mxu1 %vm428_vm1, %v5291_v63  ;;  %4206 = vmatprep.mubr.msk.bf16.mxu0 %vm428_vm1, %v5331_v39  ;;  %v343_v63 = vld [vmem:[%s5130_s20 + $0x8c] sm:$0xf] }
  0x5d   : > { %1204 = vperm.xlu0 %4717, %v5594_v51   ;;  %1209 = vperm.xlu1 %4718, %v5599_v52  }
  0x62   : > { %4173 = vmatmul.mubr.msk.bf16.vlgmr.msra.gmra.mrb[16].mxu1 %vm428_vm1, %v5307_v16  ;;  %4207 = vmatmul.mubr.msk.bf16.gmra.mrb[16].mxu0 %vm428_vm1, %v5346_v58  ;;  %v5639_v16 = vcombine.low %v342_v15, %v343_v63  ;;  %v6782_v63 = vld [vmem:[#allocation16_spill] sm:$0xff] }
  0x63   : > { %4223 = vmatpush3.bf16.msra.mxu1 %v1447_v30  ;;  %4176 = vmatprep.mubr.msk.bf16.mxu1 %vm428_vm1, %v5331_v39  ;;  %v1630_v39 = vsel %vm477_vm0, %v3809_v45, 0 }
  0x64   : > { %4210 = vmatprep.mubr.msk.bf16.mxu0 %vm428_vm1, %v5353_v3  ;;  %4635 = vmatprep.subr.msk.bf16.mxu1 %vm477_vm0, %v3809_v45  ;;  %v1390_v45 = vshrl.u32 %v5263_v53, 16 }
  0x6a   : > { %4177 = vmatmul.mubr.msk.bf16.gmra.mrb[20].mxu1 %vm428_vm1, %v5346_v58  ;;  %4211 = vmatmul.mubr.msk.bf16.gmra.mrb[20].mxu0 %vm428_vm1, %v5386_v43  ;;  %v2305_v58 = vsel %vm477_vm0, %v5443_v35, 0  ;;  %v6781_v35 = vld [vmem:[#allocation15_spill] sm:$0xff] }
  0x6b   : > { %4180 = vmatprep.mubr.msk.bf16.mxu1 %vm428_vm1, %v5353_v3  ;;  %4214 = vmatprep.mubr.msk.bf16.mxu0 %vm428_vm1, %v5401_v13  ;;  %v5659_v3 = vld [vmem:[%s6729_s1 + $0x1c] sm:$0x7] }
  0x72   : > { %4181 = vmatmul.mubr.msk.bf16.gmra.mrb[24].mxu1 %vm428_vm1, %v5386_v43  ;;  %4215 = vmatmul.mubr.msk.bf16.gmra.mrb[24].mxu0 %vm428_vm1, %v5426_v23  ;;  %v4969_v43 = vmov 1  }
  0x73   : > { %4184 = vmatprep.mubr.msk.bf16.mxu1 %vm428_vm1, %v5401_v13  ;;  %4218 = vmatprep.mubr.msk.bf16.mxu0 %vm428_vm1, %v5263_v53  ;;  %v6780_v13 = vld [vmem:[#allocation14_spill] sm:$0xff] }
  0x74   : > { %4720 = vset.pattern.permute.xlu1 %v4969_v43  ;;  %4719 = vset.pattern.permute.xlu0 %v4969_v43 }
  0x75   : > { %2681 = vperm.xlu1 %4720, %v5120_v8   ;;  %2677 = vperm.xlu0 %4719, %v5108_v5   ;;  %v6775_v5 = vld [vmem:[#allocation10_spill] sm:$0xff]  ;;  %v6777_v8 = vld [vmem:[#allocation13_spill] sm:$0xff] }
  0x79   : > { %2685 = vperm.xlu1 %4720, %v5113_v7   ;;  %2689 = vperm.xlu0 %4719, %v5125_v9   ;;  %v6776_v7 = vld [vmem:[#allocation12_spill] sm:$0xff]  ;;  %v6778_v9 = vld [vmem:[#allocation22_spill] sm:$0xff] }
  0x7a   : > { %4185 = vmatmul.mubr.msk.bf16.gmra.mrb[28].mxu1 %vm428_vm1, %v5426_v23  ;;  %4219 = vmatmul.mubr.msk.bf16.gmra.mrb[28].mxu0 %vm428_vm1, %v5639_v16  ;;  %v5664_v23 = vld [vmem:[%s6729_s1 + $0x20] sm:$0x7] }
  0x7b   : > { %4224 = vmatprep.mubr.msk.bf16.mxu1 %vm428_vm1, %v5197_v29  ;;  %4326 = vmatprep.mubr.msk.bf16.mxu0 %vm428_vm1, %v5209_v34 }
  0x7d   : > { %2693 = vperm.xlu1 %4720, %v5169_v20   ;;  %2697 = vperm.xlu0 %4719, %v5176_v22   ;;  %v3811_v20 = vcombine.low %v342_v15, %v342_v15  ;;  %v6779_v22 = vld [vmem:[#allocation23_spill] sm:$0xff] }
  0x7f   : > { %v1394_v30 = vshll.u32 %v3811_v20, 16  ;;  %v2080_v43 = vrot.slane %v3811_v20, 1  ;;  %v2481_v20 = vsel %vm477_vm0, %v5664_v23, 0 }
  0x81   : > { %2701 = vperm.xlu1 %4720, %v5204_v33   ;;  %2705 = vperm.xlu0 %4719, %v6775_v5   ;;  %v5725_v33 = vrot.slane %v5263_v53, 1  ;;  %v5746_v53 = vor.u32 %v1390_v45, %v5485_v1  ;;  %v6784_v5 = vld [vmem:[#allocation18_spill] sm:$0xff]  ;;  %v1817_v1 = vsel %vm477_vm0, %v5659_v3, 0 }
  0x82   : > { %4225 = vmatmul.mubr.msk.bf16.vlgmr.msra.gmra.mrb[32].mxu1 %vm428_vm1, %v5230_v40  ;;  %4327 = vmatmul.mubr.msk.bf16.vlgmr.msra.gmra.mrb[32].mxu0 %vm428_vm1, %v5226_v38 }
  0x83   : > { %4257 = vmatpush3.bf16.msra.mxu1 %v1630_v39  ;;  %4359 = vmatpush3.bf16.msra.mxu0 %v2305_v58  ;;  %v5733_v15 = vsel %vm2048_vm3, %v5457_v32, %v5725_v33  ;;  %v6783_v39 = vld [vmem:[#allocation17_spill] sm:$0xff]  ;;  %v1396_v58 = vrot.slane %v1394_v30, 1 }
  0x84   : > { %4228 = vmatprep.mubr.msk.bf16.mxu1 %vm428_vm1, %v5271_v57  ;;  %4330 = vmatprep.mubr.msk.bf16.mxu0 %vm428_vm1, %v5250_v50 }
  0x85   : > { %4636 = vmatprep.subr.msk.bf16.mxu1 %vm477_vm0, %v5659_v3  ;;  %4639 = vmatprep.subr.msk.bf16.mxu0 %vm477_vm0, %v5664_v23 }
  0x86   : > { %2709 = vperm.xlu1 %4720, %v6776_v7   ;;  %2713 = vperm.xlu0 %4719, %v6777_v8   ;;  %v6785_v7 = vld [vmem:[#allocation19_spill] sm:$0xff]  ;;  %v1397_v8 = vsel %vm1281_vm2, %v5746_v53, %v1396_v58 }
  0x8a   : > { %4229 = vmatmul.mubr.msk.bf16.gmra.mrb[36].mxu1 %vm428_vm1, %v5310_v18  ;;  %4331 = vmatmul.mubr.msk.bf16.gmra.mrb[36].mxu0 %vm428_vm1, %v5294_v2 }
  0x8b   : > { %4232 = vmatprep.mubr.msk.bf16.mxu1 %vm428_vm1, %v5334_v41  ;;  %4334 = vmatprep.mubr.msk.bf16.mxu0 %vm428_vm1, %v5302_v6 }
  0x8c   : > { %2717 = vperm.xlu1 %4720, %v6780_v13   ;;  %2721 = vperm.xlu0 %4719, %v6781_v35   ;;  %v2081_v13 = vsel %vm2048_vm3, %v5725_v33, %v2080_v43  ;;  %v6786_v35 = vld [vmem:[#allocation20_spill] sm:$0xff] }
  0x90   : > { %2725 = vperm.xlu1 %4720, %v6782_v63   ;;  %2729 = vperm.xlu0 %4719, %v6783_v39   ;;  %v6787_v63 = vld [vmem:[#allocation21_spill] sm:$0xff] }
  0x92   : > { %4233 = vmatmul.mubr.msk.bf16.gmra.mrb[40].mxu1 %vm428_vm1, %v5339_v49  ;;  %4335 = vmatmul.mubr.msk.bf16.gmra.mrb[40].mxu0 %vm428_vm1, %v5317_v31 }
  0x93   : > { %4236 = vmatprep.mubr.msk.bf16.mxu1 %vm428_vm1, %v5356_v4  ;;  %4338 = vmatprep.mubr.msk.bf16.mxu0 %vm428_vm1, %v5342_v55 }
  0x94   : > { %2733 = vperm.xlu1 %4720, %v6784_v5   ;;  %2737 = vperm.xlu0 %4719, %v6785_v7  }
  0x98   : > { %2741 = vperm.xlu1 %4720, %v6786_v35   ;;  %2745 = vperm.xlu0 %4719, %v6787_v63  }
  0x9a   : > { %4237 = vmatmul.mubr.msk.bf16.gmra.mrb[44].mxu1 %vm428_vm1, %v5378_v25  ;;  %4339 = vmatmul.mubr.msk.bf16.gmra.mrb[44].mxu0 %vm428_vm1, %v5359_v12 }
  0x9b   : > { %4240 = vmatprep.mubr.msk.bf16.mxu1 %vm428_vm1, %v5395_v0  ;;  %4342 = vmatprep.mubr.msk.bf16.mxu0 %vm428_vm1, %v5389_v46 }
  0x9c   : > { %2749 = vperm.xlu1 %4720, %v5462_v62   ;;  %2753 = vperm.xlu0 %4719, %v5469_v61  }
  0xa0   : > { %2757 = vperm.xlu1 %4720, %v5497_v26   ;;  %2761 = vperm.xlu0 %4719, %v5502_v27  }
  0xa2   : > { %4241 = vmatmul.mubr.msk.bf16.gmra.mrb[48].mxu1 %vm428_vm1, %v5419_v42  ;;  %4343 = vmatmul.mubr.msk.bf16.gmra.mrb[48].mxu0 %vm428_vm1, %v5404_v56 }
  0xa3   : > { %4244 = vmatprep.mubr.msk.bf16.mxu1 %vm428_vm1, %v5431_v36  ;;  %4346 = vmatprep.mubr.msk.bf16.mxu0 %vm428_vm1, %v5422_v60 }
  0xa4   : > { %2765 = vperm.xlu1 %4720, %v5526_v11   ;;  %2769 = vperm.xlu0 %4719, %v5531_v37   ;;  %v5834_v37 = vpop.permute.xlu0 %1054 }
  0xa8   : > { %2773 = vperm.xlu1 %4720, %v5546_v28   ;;  %2777 = vperm.xlu0 %4719, %v5551_v54   ;;  %v6790_v28 = vld [vmem:[#allocation24_spill] sm:$0xff] }
  0xaa   : > { %4245 = vmatmul.mubr.msk.bf16.gmra.mrb[52].mxu1 %vm428_vm1, %v5446_v59  ;;  %4347 = vmatmul.mubr.msk.bf16.gmra.mrb[52].mxu0 %vm428_vm1, %v6778_v9 }
  0xab   : > { %4248 = vmatprep.mubr.msk.bf16.mxu1 %vm428_vm1, %v5475_v17  ;;  %4350 = vmatprep.mubr.msk.bf16.mxu0 %vm428_vm1, %v6779_v22 }
  0xac   : > { %2781 = vperm.xlu1 %4720, %v5562_v21   ;;  %2785 = vperm.xlu0 %4719, %v5567_v44   ;;  %v5844_v44 = vpop.permute.xlu1 %1064 }
  0xb0   : > { %2789 = vperm.xlu1 %4720, %v5578_v47   ;;  %v5854_v3 = vpop.permute.xlu1 %1069 }
  0xb2   : > { %4249 = vmatmul.mubr.msk.bf16.gmra.mrb[56].mxu1 %vm428_vm1, %v5488_v48  ;;  %4351 = vmatmul.mubr.msk.bf16.gmra.mrb[56].mxu0 %vm428_vm1, %v5483_v14 }
  0xb3   : > { %4252 = vmatprep.mubr.msk.bf16.mxu1 %vm428_vm1, %v5509_v19  ;;  %4354 = vmatprep.mubr.msk.bf16.mxu0 %vm428_vm1, %v5733_v15 }
  0xb4   : > { %2797 = vperm.xlu1 %4720, %v5594_v51   ;;  %v5846_v51 = vpop.permute.xlu0 %1059 }
  0xba   : > { %4253 = vmatmul.mubr.msk.bf16.gmra.mrb[60].mxu1 %vm428_vm1, %v1397_v8  ;;  %4355 = vmatmul.mubr.msk.bf16.gmra.mrb[60].mxu0 %vm428_vm1, %v2081_v13 }
  0xbb   : > { %4258 = vmatprep.mubr.msk.bf16.mxu1 %vm428_vm1, %v5539_v10  ;;  %4360 = vmatprep.mubr.msk.bf16.mxu0 %vm428_vm1, %v5517_v24 }
  0xc2   : > { %4259 = vmatmul.mubr.msk.bf16.vlgmr.msra.gmra.mrb[32].mxu1 %vm428_vm1, %v5197_v29  ;;  %4361 = vmatmul.mubr.msk.bf16.vlgmr.msra.gmra.mrb[32].mxu0 %vm428_vm1, %v5209_v34  ;;  %v6788_v29 = vld [vmem:[#allocation25_spill] sm:$0xff]  ;;  %v6789_v34 = vld [vmem:[#allocation11_spill] sm:$0xff] }
  0xc3   : > { %4291 = vmatpush3.bf16.msra.mxu1 %v1817_v1  ;;  %4393 = vmatpush3.bf16.msra.mxu0 %v2481_v20  ;;  %v3828_v62 = vcombine.low %v6789_v34, %v6789_v34 }
  0xc4   : > { %4262 = vmatprep.mubr.msk.bf16.mxu1 %vm428_vm1, %v5230_v40  ;;  %4364 = vmatprep.mubr.msk.bf16.mxu0 %vm428_vm1, %v5226_v38 }
  0xc5   : > { %2793 = vperm.xlu0 %4719, %v6788_v29   ;;  %v1619_v61 = vshll.u32 %v3828_v62, 16  ;;  %v2296_v27 = vrot.slane %v3828_v62, 1 }
  0xc7   : > { %v1621_v26 = vrot.slane %v1619_v61, 1  ;;  %v2297_v21 = vsel %vm2048_vm3, %v5457_v32, %v2296_v27  ;;  %v5856_v32 = vpop.permute.xlu0 %1074 }
  0xc9   : > { %2801 = vperm.xlu0 %4719, %v5599_v52   ;;  %v1622_v54 = vsel %vm1281_vm2, %v6790_v28, %v1621_v26 }
  0xca   : > { %4263 = vmatmul.mubr.msk.bf16.gmra.mrb[36].mxu1 %vm428_vm1, %v5271_v57  ;;  %4365 = vmatmul.mubr.msk.bf16.gmra.mrb[36].mxu0 %vm428_vm1, %v5250_v50 }
  0xcb   : > { %4266 = vmatprep.mubr.msk.bf16.mxu1 %vm428_vm1, %v5310_v18  ;;  %4368 = vmatprep.mubr.msk.bf16.mxu0 %vm428_vm1, %v5294_v2 }
  0xd2   : > { %4267 = vmatmul.mubr.msk.bf16.gmra.mrb[40].mxu1 %vm428_vm1, %v5334_v41  ;;  %4369 = vmatmul.mubr.msk.bf16.gmra.mrb[40].mxu0 %vm428_vm1, %v5302_v6 }
  0xd3   : > { %4270 = vmatprep.mubr.msk.bf16.mxu1 %vm428_vm1, %v5339_v49  ;;  %4372 = vmatprep.mubr.msk.bf16.mxu0 %vm428_vm1, %v5317_v31 }
  0xda   : > { %4271 = vmatmul.mubr.msk.bf16.gmra.mrb[44].mxu1 %vm428_vm1, %v5356_v4  ;;  %4373 = vmatmul.mubr.msk.bf16.gmra.mrb[44].mxu0 %vm428_vm1, %v5342_v55 }
  0xdb   : > { %4274 = vmatprep.mubr.msk.bf16.mxu1 %vm428_vm1, %v5378_v25  ;;  %4376 = vmatprep.mubr.msk.bf16.mxu0 %vm428_vm1, %v5359_v12 }
  0xe2   : > { %4275 = vmatmul.mubr.msk.bf16.gmra.mrb[48].mxu1 %vm428_vm1, %v5395_v0  ;;  %4377 = vmatmul.mubr.msk.bf16.gmra.mrb[48].mxu0 %vm428_vm1, %v5389_v46 }
  0xe3   : > { %4278 = vmatprep.mubr.msk.bf16.mxu1 %vm428_vm1, %v5419_v42  ;;  %4380 = vmatprep.mubr.msk.bf16.mxu0 %vm428_vm1, %v5404_v56 }
  0xea   : > { %4279 = vmatmul.mubr.msk.bf16.gmra.mrb[52].mxu1 %vm428_vm1, %v5431_v36  ;;  %4381 = vmatmul.mubr.msk.bf16.gmra.mrb[52].mxu0 %vm428_vm1, %v5422_v60 }
  0xeb   : > { %4282 = vmatprep.mubr.msk.bf16.mxu1 %vm428_vm1, %v5446_v59  ;;  %4384 = vmatprep.mubr.msk.bf16.mxu0 %vm428_vm1, %v6778_v9 }
  0xf2   : > { %4283 = vmatmul.mubr.msk.bf16.gmra.mrb[56].mxu1 %vm428_vm1, %v5475_v17  ;;  %4385 = vmatmul.mubr.msk.bf16.gmra.mrb[56].mxu0 %vm428_vm1, %v6779_v22 }
  0xf3   : > { %4286 = vmatprep.mubr.msk.bf16.mxu1 %vm428_vm1, %v5488_v48  ;;  %4388 = vmatprep.mubr.msk.bf16.mxu0 %vm428_vm1, %v5483_v14 }
  0xf5   : > { %v4124_v24 = vpop.f32.mrb[0].mxu1 }
  0xf6   : > { %v515_v11 = vpop.f32.mrb[1].mxu1 }
  0xf7   : > { %v4125_v10 = vpop.f32.mrb[2].mxu1 }
  0xf8   : > { %v518_v47 = vpop.f32.mrb[3].mxu1 }
  0xfa   : > { %4287 = vmatmul.mubr.msk.bf16.gmra.mrb[60].mxu1 %vm428_vm1, %v1622_v54  ;;  %4389 = vmatmul.mubr.msk.bf16.gmra.mrb[60].mxu0 %vm428_vm1, %v2297_v21 }
  0xfb   : > { %4292 = vmatprep.mubr.msk.bf16.mxu1 %vm428_vm1, %v5230_v40  ;;  %4394 = vmatprep.mubr.msk.bf16.mxu0 %vm428_vm1, %v5226_v38  ;;  %v5866_v38 = vpop.permute.xlu1 %1079  ;;  %v5868_v40 = vpop.permute.xlu0 %1084 }
  0xfd   : > { %v4128_v52 = vpop.f32.mrb[4].mxu1 }
  0xfe   : > { %v531_v23 = vpop.f32.mrb[5].mxu1 }
  0xff   : > { %v4129_v45 = vpop.f32.mrb[6].mxu1  ;;  %v5870_v7 = vpop.permute.xlu1 %1089 }
 0x100   : > { %v534_v30 = vpop.f32.mrb[7].mxu1 }
 0x102   : > { %4293 = vmatmul.mubr.msk.bf16.vlgmr.msra.gmra.mrb[32].mxu1 %vm428_vm1, %v5271_v57  ;;  %4395 = vmatmul.mubr.msk.bf16.vlgmr.msra.gmra.mrb[32].mxu0 %vm428_vm1, %v5250_v50  ;;  %v5876_v50 = vpop.permute.xlu0 %1094 }
 0x103   : > { %4296 = vmatprep.mubr.msk.bf16.mxu1 %vm428_vm1, %v5310_v18  ;;  %4398 = vmatprep.mubr.msk.bf16.mxu0 %vm428_vm1, %v5294_v2  ;;  %v5884_v8 = vpop.permute.xlu1 %1099 }
 0x105   : > { %v4132_v39 = vpop.f32.mrb[8].mxu1 }
 0x106   : > { %v547_v58 = vpop.f32.mrb[9].mxu1 }
 0x107   : > { %v4133_v43 = vpop.f32.mrb[10].mxu1 }
 0x108   : > { %v550_v5 = vpop.f32.mrb[11].mxu1 }
 0x10a   : > { %4297 = vmatmul.mubr.msk.bf16.gmra.mrb[36].mxu1 %vm428_vm1, %v5334_v41  ;;  %4399 = vmatmul.mubr.msk.bf16.gmra.mrb[36].mxu0 %vm428_vm1, %v5302_v6  ;;  %v5888_v41 = vpop.permute.xlu0 %1104 }
 0x10b   : > { %4300 = vmatprep.mubr.msk.bf16.mxu1 %vm428_vm1, %v5339_v49  ;;  %4402 = vmatprep.mubr.msk.bf16.mxu0 %vm428_vm1, %v5317_v31  ;;  %v5898_v31 = vpop.permute.xlu1 %1109 }
 0x10d   : > { %v4136_v57 = vpop.f32.mrb[12].mxu1 }
 0x10e   : > { %v563_v2 = vpop.f32.mrb[13].mxu1  ;;  %v5902_v63 = vpop.permute.xlu0 %1114 }
 0x10f   : > { %v5882_v18 = vpop.f32.mrb[14].mxu1 }
 0x110   : > { %v5886_v13 = vpop.f32.mrb[15].mxu1 }
 0x112   : > { %4301 = vmatmul.mubr.msk.bf16.gmra.mrb[40].mxu1 %vm428_vm1, %v5356_v4  ;;  %4403 = vmatmul.mubr.msk.bf16.gmra.mrb[40].mxu0 %vm428_vm1, %v5342_v55 }
 0x113   : > { %4304 = vmatprep.mubr.msk.bf16.mxu1 %vm428_vm1, %v5378_v25  ;;  %4406 = vmatprep.mubr.msk.bf16.mxu0 %vm428_vm1, %v5359_v12  ;;  %v5918_v12 = vpop.permute.xlu1 %1119  ;;  %v5920_v25 = vpop.permute.xlu0 %1124 }
 0x115   : > { %v4192_v6 = vpop.f32.mrb[0].mxu0 }
 0x116   : > { %v5900_v49 = vadd.f32 %v4192_v6, %v4124_v24  ;;  %v861_v35 = vpop.f32.mrb[1].mxu0 }
 0x117   : > { %v5904_v1 = vadd.f32 %v861_v35, %v515_v11  ;;  %v4193_v4 = vpop.f32.mrb[2].mxu0 }
 0x118   : > { %v5906_v20 = vadd.f32 %v4193_v4, %v4125_v10  ;;  %v864_v55 = vpop.f32.mrb[3].mxu0 }
 0x119   : > { %v5908_v29 = vadd.f32 %v864_v55, %v518_v47 }
 0x11a   : > { %4305 = vmatmul.mubr.msk.bf16.gmra.mrb[44].mxu1 %vm428_vm1, %v5395_v0  ;;  %4407 = vmatmul.mubr.msk.bf16.gmra.mrb[44].mxu0 %vm428_vm1, %v5389_v46 }
 0x11b   : > { %4308 = vmatprep.mubr.msk.bf16.mxu1 %vm428_vm1, %v5419_v42  ;;  %4410 = vmatprep.mubr.msk.bf16.mxu0 %vm428_vm1, %v5404_v56  ;;  %v5930_v42 = vpop.permute.xlu1 %1129  ;;  %v5936_v56 = vpop.permute.xlu0 %1134 }
 0x11c   : > { %6791 = vst [vmem:[#allocation10_spill] sm:$0xff] %v5936_v56 }
 0x11d   : > { %v4196_v34 = vpop.f32.mrb[4].mxu0 }
 0x11e   : > { %v5922_v62 = vadd.f32 %v4196_v34, %v4128_v52  ;;  %v877_v61 = vpop.f32.mrb[5].mxu0 }
 0x11f   : > { %v5924_v26 = vadd.f32 %v877_v61, %v531_v23  ;;  %v4197_v0 = vpop.f32.mrb[6].mxu0  ;;  %v5950_v52 = vpop.permute.xlu0 %1144 }
 0x120   : > { %v5926_v27 = vadd.f32 %v4197_v0, %v4129_v45  ;;  %v880_v46 = vpop.f32.mrb[7].mxu0 }
 0x121   : > { %v5928_v24 = vadd.f32 %v880_v46, %v534_v30  ;;  %v2470_v30 = vrot.slane %v5639_v16, 1 }
 0x122   : > { %4309 = vmatmul.mubr.msk.bf16.gmra.mrb[48].mxu1 %vm428_vm1, %v5431_v36  ;;  %4411 = vmatmul.mubr.msk.bf16.gmra.mrb[48].mxu0 %vm428_vm1, %v5422_v60  ;;  %v5946_v36 = vpop.permute.xlu1 %1139 }
 0x123   : > { %4312 = vmatprep.mubr.msk.bf16.mxu1 %vm428_vm1, %v5446_v59  ;;  %4414 = vmatprep.mubr.msk.bf16.mxu0 %vm428_vm1, %v6778_v9  ;;  %6792 = vst [vmem:[#allocation12_spill] sm:$0xff] %v5946_v36  ;;  %v1798_v59 = vshll.u32 %v5639_v16, 16  ;;  %v4741_v9 = vld [vmem:[%s5130_s20 + $0x90] ss:$0 sps:$4 sm:$0x11]  }
 0x124   : > { %v1806_v35 = vshll.u32 %v4741_v9, 16 }
 0x125   : > { %v4200_v11 = vpop.f32.mrb[8].mxu0  ;;  %v1800_v45 = vrot.slane %v1798_v59, 1 }
 0x126   : > { %v5942_v10 = vadd.f32 %v4200_v11, %v4132_v39  ;;  %v893_v28 = vpop.f32.mrb[9].mxu0 }
 0x127   : > { %v5944_v54 = vadd.f32 %v893_v28, %v547_v58  ;;  %v4201_v21 = vpop.f32.mrb[10].mxu0  ;;  %v5965_v58 = vpop.permute.xlu1 %1149  ;;  %v1801_v55 = vsel %vm1281_vm2, %v5746_v53, %v1800_v45 }
 0x128   : > { %v5948_v47 = vadd.f32 %v4201_v21, %v4133_v43  ;;  %v896_v60 = vpop.f32.mrb[11].mxu0  ;;  %6793 = vst [vmem:[#allocation13_spill] sm:$0xff] %v5965_v58 }
 0x129   : > { %v5953_v23 = vadd.f32 %v896_v60, %v550_v5 }
 0x12a   : > { %4313 = vmatmul.mubr.msk.bf16.gmra.mrb[52].mxu1 %vm428_vm1, %v5475_v17  ;;  %4415 = vmatmul.mubr.msk.bf16.gmra.mrb[52].mxu0 %vm428_vm1, %v6779_v22  ;;  %v5969_v17 = vpop.permute.xlu0 %1154 }
 0x12b   : > { %4316 = vmatprep.mubr.msk.bf16.mxu1 %vm428_vm1, %v5488_v48  ;;  %4418 = vmatprep.mubr.msk.bf16.mxu0 %vm428_vm1, %v5483_v14  ;;  %6794 = vst [vmem:[#allocation22_spill] sm:$0xff] %v5969_v17  ;;  %v1802_v48 = vshrl.u32 %v5639_v16, 16  ;;  %v5990_v53 = vpop.permute.xlu1 %1159  ;;  %v1212_v17 = vmul.f32 %v5904_v1, %v5834_v37 }
 0x12c   : > { %6795 = vst [vmem:[#allocation23_spill] sm:$0xff] %v5990_v53 }
 0x12d   : > { %v4204_v39 = vpop.f32.mrb[12].mxu0  ;;  %v1804_v16 = vor.u32 %v1802_v48, %v1800_v45 }
 0x12e   : > { %v5967_v43 = vadd.f32 %v4204_v39, %v4136_v57  ;;  %v909_v5 = vpop.f32.mrb[13].mxu0  ;;  %v2471_v57 = vsel %vm2048_vm3, %v5725_v33, %v2470_v30  ;;  %v5992_v61 = vpop.permute.xlu0 %1164 }
 0x12f   : > { %v5971_v6 = vadd.f32 %v909_v5, %v563_v2  ;;  %v4205_v22 = vpop.f32.mrb[14].mxu0  ;;  %v1808_v2 = vrot.slane %v1806_v35, 1  ;;  %6796 = vst [vmem:[#allocation14_spill] sm:$0xff] %v5992_v61  ;;  %v6006_v5 = vpop.permute.xlu1 %1169 }
 0x130   : > { %v5975_v14 = vadd.f32 %v4205_v22, %v5882_v18  ;;  %v912_v4 = vpop.f32.mrb[15].mxu0  ;;  %v2472_v18 = vrot.slane %v4741_v9, 1  ;;  %6801 = vst [vmem:[#allocation19_spill] sm:$0xff] %v6006_v5 }
 0x131   : > { %v5982_v34 = vadd.f32 %v912_v4, %v5886_v13  ;;  %v1809_v21 = vsel %vm1281_vm2, %v1804_v16, %v1808_v2 }
 0x132   : > { %4317 = vmatmul.mubr.msk.bf16.gmra.mrb[56].mxu1 %vm428_vm1, %v5509_v19  ;;  %4419 = vmatmul.mubr.msk.bf16.gmra.mrb[56].mxu0 %vm428_vm1, %v5733_v15  ;;  %v2473_v60 = vsel %vm2048_vm3, %v2470_v30, %v2472_v18  ;;  %v6008_v22 = vpop.permute.xlu0 %1174 }
 0x133   : > { %4320 = vmatprep.mubr.msk.bf16.mxu1 %vm428_vm1, %v1801_v55  ;;  %4422 = vmatprep.mubr.msk.bf16.mxu0 %vm428_vm1, %v2471_v57  ;;  %6802 = vst [vmem:[#allocation20_spill] sm:$0xff] %v6008_v22 }
 0x135   : > { %v4174_v33 = vpop.f32.mrb[16].mxu1  ;;  %v4208_v13 = vpop.f32.mrb[16].mxu0 }
 0x136   : > { %v5994_v0 = vadd.f32 %v4208_v13, %v4174_v33  ;;  %v751_v46 = vpop.f32.mrb[17].mxu1  ;;  %v925_v19 = vpop.f32.mrb[17].mxu0 }
 0x137   : > { %v5996_v11 = vadd.f32 %v925_v19, %v751_v46  ;;  %v4175_v15 = vpop.f32.mrb[18].mxu1  ;;  %v4209_v28 = vpop.f32.mrb[18].mxu0 }
 0x138   : > { %6797 = vst [vmem:[#allocation15_spill] sm:$0xff] %v5994_v0  ;;  %v6000_v59 = vadd.f32 %v4209_v28, %v4175_v15  ;;  %v754_v9 = vpop.f32.mrb[19].mxu1  ;;  %v928_v45 = vpop.f32.mrb[19].mxu0 }
 0x139   : > { %6798 = vst [vmem:[#allocation16_spill] sm:$0xff] %v5996_v11  ;;  %v6002_v39 = vadd.f32 %v928_v45, %v754_v9  ;;  %v6018_v19 = vpop.permute.xlu1 %1179  ;;  %v6020_v15 = vpop.permute.xlu0 %1184  ;;  %v1213_v11 = vmul.f32 %v5908_v29, %v5846_v51 }
 0x13a   : > { %6799 = vst [vmem:[#allocation17_spill] sm:$0xff] %v6000_v59  ;;  %4321 = vmatmul.mubr.msk.bf16.gmra.mrb[60].mxu1 %vm428_vm1, %v1809_v21  ;;  %4423 = vmatmul.mubr.msk.bf16.gmra.mrb[60].mxu0 %vm428_vm1, %v2473_v60  ;;  %6807 = vst [vmem:[#allocation26_spill] sm:$0xff] %v6018_v19 }
 0x13b   : > { %6800 = vst [vmem:[#allocation18_spill] sm:$0xff] %v6002_v39  ;;  %6808 = vst [vmem:[#allocation27_spill] sm:$0xff] %v6020_v15 }
 0x13d   : > { %v4178_v48 = vpop.f32.mrb[20].mxu1  ;;  %v4212_v35 = vpop.f32.mrb[20].mxu0 }
 0x13e   : > { %v6010_v4 = vadd.f32 %v4212_v35, %v4178_v48  ;;  %v767_v55 = vpop.f32.mrb[21].mxu1  ;;  %v941_v30 = vpop.f32.mrb[21].mxu0 }
 0x13f   : > { %v6012_v57 = vadd.f32 %v941_v30, %v767_v55  ;;  %v4179_v16 = vpop.f32.mrb[22].mxu1  ;;  %v4213_v2 = vpop.f32.mrb[22].mxu0 }
 0x140   : > { %6803 = vst [vmem:[#allocation21_spill] sm:$0xff] %v6010_v4  ;;  %v6014_v18 = vadd.f32 %v4213_v2, %v4179_v16  ;;  %v770_v33 = vpop.f32.mrb[23].mxu1  ;;  %v944_v13 = vpop.f32.mrb[23].mxu0  ;;  %v1215_v4 = vmul.f32 %v5906_v20, %v5854_v3 }
 0x141   : > { %6804 = vst [vmem:[#allocation25_spill] sm:$0xff] %v6012_v57  ;;  %v6016_v46 = vadd.f32 %v944_v13, %v770_v33  ;;  %v6030_v13 = vpop.permute.xlu1 %1189  ;;  %v1195_v19 = vpop.permute.xlu0 %1194 }
 0x142   : > { %6805 = vst [vmem:[#allocation11_spill] sm:$0xff] %v6014_v18  ;;  %6813 = vst [vmem:[#allocation32_spill] sm:$0xff] %v6030_v13  ;;  %v1214_v18 = vmul.f32 %v5900_v49, %v5844_v44 }
 0x143   : > { %6806 = vst [vmem:[#allocation24_spill] sm:$0xff] %v6016_v46 }
 0x145   : > { %v4182_v28 = vpop.f32.mrb[24].mxu1  ;;  %v4216_v21 = vpop.f32.mrb[24].mxu0 }
 0x146   : > { %v6022_v60 = vadd.f32 %v4216_v21, %v4182_v28  ;;  %v783_v9 = vpop.f32.mrb[25].mxu1  ;;  %v957_v45 = vpop.f32.mrb[25].mxu0 }
 0x147   : > { %v6024_v48 = vadd.f32 %v957_v45, %v783_v9  ;;  %v4183_v35 = vpop.f32.mrb[26].mxu1  ;;  %v4217_v55 = vpop.f32.mrb[26].mxu0 }
 0x148   : > { %6809 = vst [vmem:[#allocation28_spill] sm:$0xff] %v6022_v60  ;;  %v6026_v30 = vadd.f32 %v4217_v55, %v4183_v35  ;;  %v786_v16 = vpop.f32.mrb[27].mxu1  ;;  %v960_v2 = vpop.f32.mrb[27].mxu0 }
 0x149   : > { %6810 = vst [vmem:[#allocation29_spill] sm:$0xff] %v6024_v48  ;;  %v6028_v33 = vadd.f32 %v960_v2, %v786_v16  ;;  %v1200_v2 = vpop.permute.xlu1 %1199  ;;  %v6041_v13 = vpop.permute.xlu0 %1204 }
 0x14a   : > { %6811 = vst [vmem:[#allocation30_spill] sm:$0xff] %v6026_v30  ;;  %6818 = vst [vmem:[#allocation37_spill] sm:$0xff] %v6041_v13 }
 0x14b   : > { %6812 = vst [vmem:[#allocation31_spill] sm:$0xff] %v6028_v33 }
 0x14d   : > { %v4186_v22 = vpop.f32.mrb[28].mxu1  ;;  %v4220_v15 = vpop.f32.mrb[28].mxu0 }
 0x14e   : > { %v6032_v28 = vadd.f32 %v4220_v15, %v4186_v22  ;;  %v799_v21 = vpop.f32.mrb[29].mxu1  ;;  %v973_v60 = vpop.f32.mrb[29].mxu0 }
 0x14f   : > { %v4467_v9 = vadd.f32 %v973_v60, %v799_v21  ;;  %v4187_v45 = vpop.f32.mrb[30].mxu1  ;;  %v4221_v48 = vpop.f32.mrb[30].mxu0 }
 0x150   : > { %6814 = vst [vmem:[#allocation33_spill] sm:$0xff] %v6032_v28  ;;  %v6034_v46 = vadd.f32 %v4221_v48, %v4187_v45  ;;  %v802_v35 = vpop.f32.mrb[31].mxu1  ;;  %v976_v55 = vpop.f32.mrb[31].mxu0 }
 0x151   : > { %v4469_v30 = vadd.f32 %v976_v55, %v802_v35  ;;  %v6036_v16 = vmul.f32 %v4467_v9, %v1195_v19  ;;  %v6043_v22 = vpop.permute.xlu1 %1209  ;;  %v2678_v28 = vpop.permute.xlu0 %2677 }
 0x152   : > { %6815 = vst [vmem:[#allocation34_spill] sm:$0xff] %v6034_v46  ;;  %6819 = vst [vmem:[#allocation38_spill] sm:$0xff] %v6043_v22 }
 0x153   : > { %6816 = vst [vmem:[#allocation35_spill] sm:$0xff] %v6036_v16  ;;  %v6038_v33 = vmul.f32 %v4469_v30, %v1200_v2 }
 0x155   : > { %6817 = vst [vmem:[#allocation36_spill] sm:$0xff] %v6038_v33  ;;  %v2682_v15 = vpop.permute.xlu1 %2681  ;;  %v2690_v21 = vpop.permute.xlu0 %2689 }
 0x159   : > { %v2686_v60 = vpop.permute.xlu1 %2685  ;;  %v6045_v48 = vpop.permute.xlu0 %2697 }
 0x15d   : > { %v2694_v53 = vpop.permute.xlu1 %2693  ;;  %v2706_v46 = vpop.permute.xlu0 %2705 }
 0x161   : > { %v2702_v45 = vpop.permute.xlu1 %2701  ;;  %v6049_v19 = vpop.permute.xlu0 %2713 }
 0x165   : > { %v6047_v35 = vpop.permute.xlu1 %2709  ;;  %v6053_v9 = vpop.permute.xlu0 %2721 }
 0x169   : > { %v6051_v30 = vpop.permute.xlu1 %2717  ;;  %v6057_v2 = vpop.permute.xlu0 %2729 }
 0x16d   : > { %v6055_v55 = vpop.permute.xlu1 %2725  ;;  %v6061_v16 = vpop.permute.xlu0 %2737 }
 0x171   : > { %v6059_v33 = vpop.permute.xlu1 %2733  ;;  %v6065_v13 = vpop.permute.xlu0 %2745 }
 0x172   : > { %6821 = vst [vmem:[#allocation40_spill] sm:$0xff] %v6065_v13 }
 0x175   : > { %v6063_v22 = vpop.permute.xlu1 %2741  ;;  %v6090_v29 = vpop.permute.xlu0 %2753 }
 0x176   : > { %6820 = vst [vmem:[#allocation39_spill] sm:$0xff] %v6063_v22  ;;  %v6076_v22 = vld [vmem:[%s6730_s2] ss:$0 sm:$0xff] }
 0x179   : > { %v6088_v51 = vpop.permute.xlu1 %2749 }
 0x1d5   : > { %v4294_v5 = vpop.f32.mrb[32].mxu1  ;;  %v4396_v57 = vpop.f32.mrb[32].mxu0 }
 0x1d6   : > { %v2014_v61 = vadd.f32 %v4294_v5, %v1214_v18  ;;  %v2806_v39 = vmul.f32 %v4396_v57, %v2686_v60  ;;  %v1853_v36 = vpop.f32.mrb[33].mxu1  ;;  %v2517_v59 = vpop.f32.mrb[33].mxu0 }
 0x1d7   : > { %v2012_v13 = vadd.f32 %v1853_v36, %v1212_v17  ;;  %v2804_v58 = vmul.f32 %v2678_v28, %v2517_v59  ;;  %v4295_v44 = vpop.f32.mrb[34].mxu1  ;;  %v4397_v49 = vpop.f32.mrb[34].mxu0  ;;  %v1218_v59 = vmul.f32 %v5922_v62, %v5868_v40 }
 0x1d8   : > { %v2838_v37 = vadd.f32 %v2806_v39, %v2014_v61  ;;  %v2015_v1 = vadd.f32 %v4295_v44, %v1215_v4  ;;  %v2807_v56 = vmul.f32 %v4397_v49, %v2690_v21  ;;  %v1856_v3 = vpop.f32.mrb[35].mxu1  ;;  %v2520_v20 = vpop.f32.mrb[35].mxu0  ;;  %v1219_v4 = vmul.f32 %v5926_v27, %v5870_v7 }
 0x1d9   : > { %v2836_v5 = vadd.f32 %v2804_v58, %v2012_v13  ;;  %v2013_v57 = vadd.f32 %v1856_v3, %v1213_v11  ;;  %v2805_v18 = vmul.f32 %v2682_v15, %v2520_v20  ;;  %v1217_v49 = vmul.f32 %v5928_v24, %v5866_v38  ;;  %v6113_v24 = vpop.permute.xlu1 %2757 }
 0x1da   : > { %v6081_v60 = vadd.f32 %v6076_v22, %v2838_v37  ;;  %v2839_v0 = vadd.f32 %v2807_v56, %v2015_v1  ;;  %v1216_v56 = vmul.f32 %v5924_v26, %v5856_v32  ;;  %v1222_v38 = vmul.f32 %v5942_v10, %v5888_v41 }
 0x1db   : > { %v6084_v36 = vadd.f32 %v6076_v22, %v2836_v5  ;;  %v2837_v17 = vadd.f32 %v2805_v18, %v2013_v57 }
 0x1dc   : > { %v6093_v61 = vadd.f32 %v6076_v22, %v2839_v0 }
 0x1dd   : > { %v6096_v58 = vadd.f32 %v6076_v22, %v2837_v17  ;;  %v4298_v11 = vpop.f32.mrb[36].mxu1  ;;  %v4400_v39 = vpop.f32.mrb[36].mxu0 }
 0x1de   : > { %v2018_v13 = vadd.f32 %v4298_v11, %v1218_v59  ;;  %v2810_v40 = vmul.f32 %v4400_v39, %v2702_v45  ;;  %v1869_v62 = vpop.f32.mrb[37].mxu1  ;;  %v2533_v28 = vpop.f32.mrb[37].mxu0  ;;  %v1220_v11 = vmul.f32 %v5944_v54, %v5876_v50  ;;  %v1223_v39 = vmul.f32 %v5948_v47, %v5898_v31 }
 0x1df   : > { %v2016_v15 = vadd.f32 %v1869_v62, %v1216_v56  ;;  %v2808_v21 = vmul.f32 %v2694_v53, %v2533_v28  ;;  %v4299_v44 = vpop.f32.mrb[38].mxu1  ;;  %v4401_v0 = vpop.f32.mrb[38].mxu0 }
 0x1e0   : > { %v2842_v37 = vadd.f32 %v2810_v40, %v2018_v13  ;;  %v2019_v1 = vadd.f32 %v4299_v44, %v1219_v4  ;;  %v2811_v3 = vmul.f32 %v4401_v0, %v2706_v46  ;;  %v1872_v20 = vpop.f32.mrb[39].mxu1  ;;  %v2536_v5 = vpop.f32.mrb[39].mxu0 }
 0x1e1   : > { %v2840_v32 = vadd.f32 %v2808_v21, %v2016_v15  ;;  %v2017_v26 = vadd.f32 %v1872_v20, %v1217_v49  ;;  %v2809_v7 = vmul.f32 %v6045_v48, %v2536_v5  ;;  %v6115_v46 = vpop.permute.xlu0 %2761  ;;  %v1221_v15 = vmul.f32 %v5953_v23, %v5884_v8  ;;  %v6141_v23 = vpop.permute.xlu1 %2765 }
 0x1e2   : > { %v6106_v27 = vadd.f32 %v6076_v22, %v2842_v37  ;;  %v2843_v45 = vadd.f32 %v2811_v3, %v2019_v1  ;;  %v1226_v8 = vmul.f32 %v5967_v43, %v5920_v25 }
 0x1e3   : > { %v6109_v53 = vadd.f32 %v6076_v22, %v2840_v32  ;;  %v2841_v57 = vadd.f32 %v2809_v7, %v2017_v26  ;;  %v1224_v32 = vmul.f32 %v5971_v6, %v5902_v63  ;;  %v1227_v26 = vmul.f32 %v5975_v14, %v5930_v42 }
 0x1e4   : > { %v6118_v18 = vadd.f32 %v6076_v22, %v2843_v45 }
 0x1e5   : > { %v6121_v48 = vadd.f32 %v6076_v22, %v2841_v57  ;;  %v4302_v17 = vpop.f32.mrb[40].mxu1  ;;  %v4404_v59 = vpop.f32.mrb[40].mxu0 }
 0x1e6   : > { %v2022_v56 = vadd.f32 %v4302_v17, %v1222_v38  ;;  %v2814_v41 = vmul.f32 %v4404_v59, %v6051_v30  ;;  %v1885_v10 = vpop.f32.mrb[41].mxu1  ;;  %v2549_v4 = vpop.f32.mrb[41].mxu0 }
 0x1e7   : > { %v2020_v13 = vadd.f32 %v1885_v10, %v1220_v11  ;;  %v2812_v40 = vmul.f32 %v6047_v35, %v2549_v4  ;;  %v4303_v62 = vpop.f32.mrb[42].mxu1  ;;  %v4405_v28 = vpop.f32.mrb[42].mxu0  ;;  %v1225_v11 = vmul.f32 %v5982_v34, %v5918_v12  ;;  %v6822_v12 = vld [vmem:[#allocation15_spill] sm:$0xff] }
 0x1e8   : > { %v2846_v21 = vadd.f32 %v2814_v41, %v2022_v56  ;;  %v2023_v44 = vadd.f32 %v4303_v62, %v1223_v39  ;;  %v2815_v50 = vmul.f32 %v4405_v28, %v6053_v9  ;;  %v1888_v54 = vpop.f32.mrb[43].mxu1  ;;  %v2552_v0 = vpop.f32.mrb[43].mxu0  ;;  %v1230_v34 = vmul.f32 %v6822_v12, %v5950_v52 }
 0x1e9   : > { %v2844_v31 = vadd.f32 %v2812_v40, %v2020_v13  ;;  %v2021_v47 = vadd.f32 %v1888_v54, %v1221_v15  ;;  %v2813_v30 = vmul.f32 %v6049_v19, %v2552_v0  ;;  %v6143_v9 = vpop.permute.xlu0 %2769  ;;  %v6169_v40 = vpop.permute.xlu1 %2773  ;;  %v6825_v54 = vld [vmem:[#allocation13_spill] sm:$0xff] }
 0x1ea   : > { %v6134_v49 = vadd.f32 %v6076_v22, %v2846_v21  ;;  %v2847_v37 = vadd.f32 %v2815_v50, %v2023_v44  ;;  %v6823_v21 = vld [vmem:[#allocation10_spill] sm:$0xff]  ;;  %v6824_v44 = vld [vmem:[#allocation16_spill] sm:$0xff]  ;;  %v6826_v0 = vld [vmem:[#allocation17_spill] sm:$0xff] }
 0x1eb   : > { %v6137_v35 = vadd.f32 %v6076_v22, %v2844_v31  ;;  %v2845_v1 = vadd.f32 %v2813_v30, %v2021_v47  ;;  %v1228_v50 = vmul.f32 %v6824_v44, %v6823_v21  ;;  %v1231_v31 = vmul.f32 %v6826_v0, %v6825_v54  ;;  %v6834_v21 = vld [vmem:[#allocation25_spill] sm:$0xff]  ;;  %v6836_v54 = vld [vmem:[#allocation11_spill] sm:$0xff] }
 0x1ec   : > { %v6146_v3 = vadd.f32 %v6076_v22, %v2847_v37 }
 0x1ed   : > { %v6149_v19 = vadd.f32 %v6076_v22, %v2845_v1  ;;  %v4306_v20 = vpop.f32.mrb[44].mxu1  ;;  %v4408_v5 = vpop.f32.mrb[44].mxu0 }
 0x1ee   : > { %v2026_v7 = vadd.f32 %v4306_v20, %v1226_v8  ;;  %v2818_v25 = vmul.f32 %v4408_v5, %v6059_v33  ;;  %v1901_v43 = vpop.f32.mrb[45].mxu1  ;;  %v2565_v45 = vpop.f32.mrb[45].mxu0  ;;  %v6827_v8 = vld [vmem:[#allocation39_spill] sm:$0xff] }
 0x1ef   : > { %v2024_v57 = vadd.f32 %v1901_v43, %v1224_v32  ;;  %v2816_v38 = vmul.f32 %v6055_v55, %v2565_v45  ;;  %v4307_v17 = vpop.f32.mrb[46].mxu1  ;;  %v4409_v59 = vpop.f32.mrb[46].mxu0 }
 0x1f0   : > { %v2850_v39 = vadd.f32 %v2818_v25, %v2026_v7  ;;  %v2027_v56 = vadd.f32 %v4307_v17, %v1227_v26  ;;  %v2819_v63 = vmul.f32 %v4409_v59, %v6061_v16  ;;  %v1904_v6 = vpop.f32.mrb[47].mxu1  ;;  %v2568_v41 = vpop.f32.mrb[47].mxu0  ;;  %v6828_v26 = vld [vmem:[#allocation12_spill] sm:$0xff]  ;;  %v6829_v7 = vld [vmem:[#allocation18_spill] sm:$0xff] }
 0x1f1   : > { %v2848_v42 = vadd.f32 %v2816_v38, %v2024_v57  ;;  %v2025_v14 = vadd.f32 %v1904_v6, %v1225_v11  ;;  %v2817_v33 = vmul.f32 %v6057_v2, %v2568_v41  ;;  %v6171_v16 = vpop.permute.xlu0 %2777  ;;  %v1229_v25 = vmul.f32 %v6829_v7, %v6828_v26 }
 0x1f2   : > { %v6162_v10 = vadd.f32 %v6076_v22, %v2850_v39  ;;  %v2851_v4 = vadd.f32 %v2819_v63, %v2027_v56  ;;  %v6830_v39 = vld [vmem:[#allocation40_spill] sm:$0xff] }
 0x1f3   : > { %v6165_v55 = vadd.f32 %v6076_v22, %v2848_v42  ;;  %v2849_v13 = vadd.f32 %v2817_v33, %v2025_v14  ;;  %v6831_v42 = vld [vmem:[#allocation14_spill] sm:$0xff]  ;;  %v6832_v14 = vld [vmem:[#allocation21_spill] sm:$0xff] }
 0x1f4   : > { %v6174_v62 = vadd.f32 %v6076_v22, %v2851_v4  ;;  %v1234_v33 = vmul.f32 %v6832_v14, %v6831_v42  ;;  %v2782_v4 = vpop.permute.xlu1 %2781 }
 0x1f5   : > { %v6177_v2 = vadd.f32 %v6076_v22, %v2849_v13  ;;  %v4310_v28 = vpop.f32.mrb[48].mxu1  ;;  %v4412_v15 = vpop.f32.mrb[48].mxu0 }
 0x1f6   : > { %v2030_v47 = vadd.f32 %v4310_v28, %v1230_v34  ;;  %v2822_v52 = vmul.f32 %v4412_v15, %v6088_v51  ;;  %v1917_v30 = vpop.f32.mrb[49].mxu1  ;;  %v2581_v37 = vpop.f32.mrb[49].mxu0  ;;  %v6833_v15 = vld [vmem:[#allocation22_spill] sm:$0xff] }
 0x1f7   : > { %v2028_v1 = vadd.f32 %v1917_v30, %v1228_v50  ;;  %v2820_v20 = vmul.f32 %v6827_v8, %v2581_v37  ;;  %v4311_v5 = vpop.f32.mrb[50].mxu1  ;;  %v4413_v32 = vpop.f32.mrb[50].mxu0  ;;  %v1232_v44 = vmul.f32 %v6834_v21, %v6833_v15  ;;  %v6835_v50 = vld [vmem:[#allocation19_spill] sm:$0xff]  ;;  %v6842_v15 = vld [vmem:[#allocation29_spill] sm:$0xff] }
 0x1f8   : > { %v2854_v43 = vadd.f32 %v2822_v52, %v2030_v47  ;;  %v2031_v45 = vadd.f32 %v4311_v5, %v1231_v31  ;;  %v2823_v57 = vmul.f32 %v4413_v32, %v6090_v29  ;;  %v1920_v38 = vpop.f32.mrb[51].mxu1  ;;  %v2584_v17 = vpop.f32.mrb[51].mxu0  ;;  %v1235_v0 = vmul.f32 %v6836_v54, %v6835_v50  ;;  %v6837_v5 = vld [vmem:[#allocation23_spill] sm:$0xff]  ;;  %v6838_v32 = vld [vmem:[#allocation24_spill] sm:$0xff]  ;;  %v6844_v50 = vld [vmem:[#allocation30_spill] sm:$0xff] }
 0x1f9   : > { %v2852_v59 = vadd.f32 %v2820_v20, %v2028_v1  ;;  %v2029_v11 = vadd.f32 %v1920_v38, %v1229_v25  ;;  %v2821_v51 = vmul.f32 %v6830_v39, %v2584_v17  ;;  %v2786_v13 = vpop.permute.xlu0 %2785  ;;  %v1233_v26 = vmul.f32 %v6838_v32, %v6837_v5  ;;  %v2790_v42 = vpop.permute.xlu1 %2789  ;;  %v6846_v5 = vld [vmem:[#allocation31_spill] sm:$0xff] }
 0x1fa   : > { %v6190_v56 = vadd.f32 %v6076_v22, %v2854_v43  ;;  %v2855_v63 = vadd.f32 %v2823_v57, %v2031_v45 }
 0x1fb   : > { %v6193_v6 = vadd.f32 %v6076_v22, %v2852_v59  ;;  %v2853_v41 = vadd.f32 %v2821_v51, %v2029_v11  ;;  %v6839_v51 = vld [vmem:[#allocation27_spill] sm:$0xff] }
 0x1fc   : > { %v6198_v29 = vadd.f32 %v6076_v22, %v2855_v63  ;;  %v6840_v63 = vld [vmem:[#allocation28_spill] sm:$0xff] }
 0x1fd   : > { %v6201_v12 = vadd.f32 %v6076_v22, %v2853_v41  ;;  %v4314_v34 = vpop.f32.mrb[52].mxu1  ;;  %v4416_v28 = vpop.f32.mrb[52].mxu0  ;;  %v1238_v41 = vmul.f32 %v6840_v63, %v6839_v51  ;;  %v6848_v51 = vld [vmem:[#allocation33_spill] sm:$0xff] }
 0x1fe   : > { %v2034_v31 = vadd.f32 %v4314_v34, %v1234_v33  ;;  %v2826_v47 = vmul.f32 %v4416_v28, %v6141_v23  ;;  %v1933_v52 = vpop.f32.mrb[53].mxu1  ;;  %v2597_v30 = vpop.f32.mrb[53].mxu0  ;;  %v6841_v28 = vld [vmem:[#allocation20_spill] sm:$0xff] }
 0x1ff   : > { %v2032_v37 = vadd.f32 %v1933_v52, %v1232_v44  ;;  %v2824_v1 = vmul.f32 %v6113_v24, %v2597_v30  ;;  %v4315_v8 = vpop.f32.mrb[54].mxu1  ;;  %v4417_v20 = vpop.f32.mrb[54].mxu0  ;;  %v1236_v21 = vmul.f32 %v6842_v15, %v6841_v28  ;;  %v6843_v44 = vld [vmem:[#allocation32_spill] sm:$0xff]  ;;  %v6849_v15 = vld [vmem:[#allocation38_spill] sm:$0xff] }
 0x200   : > { %v2858_v7 = vadd.f32 %v2826_v47, %v2034_v31  ;;  %v2035_v25 = vadd.f32 %v4315_v8, %v1235_v0  ;;  %v2827_v43 = vmul.f32 %v4417_v20, %v6143_v9  ;;  %v1936_v45 = vpop.f32.mrb[55].mxu1  ;;  %v2600_v57 = vpop.f32.mrb[55].mxu0  ;;  %v1239_v54 = vmul.f32 %v6844_v50, %v6843_v44  ;;  %v6845_v20 = vld [vmem:[#allocation26_spill] sm:$0xff] }
 0x201   : > { %v2856_v38 = vadd.f32 %v2824_v1, %v2032_v37  ;;  %v2033_v17 = vadd.f32 %v1936_v45, %v1233_v26  ;;  %v2825_v23 = vmul.f32 %v6115_v46, %v2600_v57  ;;  %v2794_v14 = vpop.permute.xlu0 %2793  ;;  %v1237_v32 = vmul.f32 %v6846_v5, %v6845_v20 }
 0x202   : > { %v6214_v59 = vadd.f32 %v6076_v22, %v2858_v7  ;;  %v2859_v11 = vadd.f32 %v2827_v43, %v2035_v25 }
 0x203   : > { %v6217_v24 = vadd.f32 %v6076_v22, %v2856_v38  ;;  %v2857_v39 = vadd.f32 %v2825_v23, %v2033_v17 }
 0x204   : > { %v6222_v9 = vadd.f32 %v6076_v22, %v2859_v11 }
 0x205   : > { %v6225_v33 = vadd.f32 %v6076_v22, %v2857_v39  ;;  %v4318_v46 = vpop.f32.mrb[56].mxu1  ;;  %v4420_v34 = vpop.f32.mrb[56].mxu0  ;;  %v6847_v39 = vld [vmem:[#allocation37_spill] sm:$0xff] }
 0x206   : > { %v2038_v0 = vadd.f32 %v4318_v46, %v1238_v41  ;;  %v2830_v31 = vmul.f32 %v4420_v34, %v2782_v4  ;;  %v1949_v47 = vpop.f32.mrb[57].mxu1  ;;  %v2613_v52 = vpop.f32.mrb[57].mxu0  ;;  %v1242_v63 = vmul.f32 %v6848_v51, %v6847_v39 }
 0x207   : > { %v2036_v30 = vadd.f32 %v1949_v47, %v1236_v21  ;;  %v2828_v37 = vmul.f32 %v6169_v40, %v2613_v52  ;;  %v4319_v1 = vpop.f32.mrb[58].mxu1  ;;  %v4421_v8 = vpop.f32.mrb[58].mxu0  ;;  %v6850_v21 = vld [vmem:[#allocation34_spill] sm:$0xff]  ;;  %v6851_v47 = vld [vmem:[#allocation35_spill] sm:$0xff] }
 0x208   : > { %v2862_v26 = vadd.f32 %v2830_v31, %v2038_v0  ;;  %v2039_v7 = vadd.f32 %v4319_v1, %v1239_v54  ;;  %v2831_v25 = vmul.f32 %v4421_v8, %v2786_v13  ;;  %v1952_v43 = vpop.f32.mrb[59].mxu1  ;;  %v2616_v45 = vpop.f32.mrb[59].mxu0  ;;  %v1243_v44 = vmul.f32 %v6850_v21, %v6849_v15 }
 0x209   : > { %v2860_v57 = vadd.f32 %v2828_v37, %v2036_v30  ;;  %v2037_v38 = vadd.f32 %v1952_v43, %v1237_v32  ;;  %v2829_v17 = vmul.f32 %v6171_v16, %v2616_v45  ;;  %v2798_v41 = vpop.permute.xlu1 %2797  ;;  %v2802_v46 = vpop.permute.xlu0 %2801 }
 0x20a   : > { %v6236_v4 = vadd.f32 %v6076_v22, %v2862_v26  ;;  %v2863_v23 = vadd.f32 %v2831_v25, %v2039_v7  ;;  %v6852_v25 = vld [vmem:[#allocation36_spill] sm:$0xff] }
 0x20b   : > { %v6239_v40 = vadd.f32 %v6076_v22, %v2860_v57  ;;  %v2861_v11 = vadd.f32 %v2829_v17, %v2037_v38 }
 0x20c   : > { %v6244_v13 = vadd.f32 %v6076_v22, %v2863_v23 }
 0x20d   : > { %v6247_v34 = vadd.f32 %v6076_v22, %v2861_v11  ;;  %v4322_v16 = vpop.f32.mrb[60].mxu1  ;;  %v4424_v28 = vpop.f32.mrb[60].mxu0 }
 0x20e   : > { %v2042_v50 = vadd.f32 %v4322_v16, %v1242_v63  ;;  %v2834_v54 = vmul.f32 %v4424_v28, %v2798_v41  ;;  %v1965_v0 = vpop.f32.mrb[61].mxu1  ;;  %v2629_v31 = vpop.f32.mrb[61].mxu0 }
 0x20f   : > { %v2040_v52 = vadd.f32 %v1965_v0, %v6851_v47  ;;  %v2832_v30 = vmul.f32 %v2790_v42, %v2629_v31  ;;  %v4323_v37 = vpop.f32.mrb[62].mxu1  ;;  %v4425_v1 = vpop.f32.mrb[62].mxu0  ;;  %2912 = sbr.rel (!%p2907_p13) target bundleno = 534 (0x216), region = 52 }
 0x210   : > { %v2866_v8 = vadd.f32 %v2834_v54, %v2042_v50  ;;  %v2043_v20 = vadd.f32 %v4323_v37, %v1243_v44  ;;  %v2835_v5 = vmul.f32 %v4425_v1, %v2802_v46  ;;  %v1968_v32 = vpop.f32.mrb[63].mxu1  ;;  %v2632_v26 = vpop.f32.mrb[63].mxu0 }
 0x211   : > { %v2864_v7 = vadd.f32 %v2832_v30, %v2040_v52  ;;  %v2041_v43 = vadd.f32 %v1968_v32, %v6852_v25  ;;  %v2833_v45 = vmul.f32 %v2794_v14, %v2632_v26  ;;  %v4970_v14 = vmov (%p2907_p13), 0.0  }
 0x212   : > { %v6254_v57 = vadd.f32 %v6076_v22, %v2866_v8  ;;  %v2867_v38 = vadd.f32 %v2835_v5, %v2043_v20  ;;  %2914 = vst.msk [vmem:[#allocation2] sm:$0x1] (%p2907_p13), %vm2913_vm4, %v4970_v14  ;;  %2915 = vst.msk [vmem:[#allocation3] sm:$0x1] (%p2907_p13), %vm2913_vm4, %v4970_v14 }
 0x213   : > { %v6257_v17 = vadd.f32 %v6076_v22, %v2864_v7  ;;  %v2865_v42 = vadd.f32 %v2833_v45, %v2041_v43 }
 0x214   : > { %v6260_v23 = vadd.f32 %v6076_v22, %v2867_v38 }
 0x215   : > { %v6263_v11 = vadd.f32 %v6076_v22, %v2865_v42 }
 0x216 PF: > { %p3916_p0 = scmp.ne.s32.totalorder %s4950_s27, 0 }
 0x217   : > { %vm2920_vm5 = vcmask (!%p3916_p0), 64512   ;;  %v2994_v52 = vmul.f32 (!%p3916_p0), %v6084_v36, %v6084_v36  ;;  %v2995_v37 = vmul.f32 (!%p3916_p0), %v6096_v58, %v6096_v58  ;;  %v2996_v1 = vmul.f32 (!%p3916_p0), %v6081_v60, %v6081_v60 }
 0x218   : > { %2918 = sbr.rel (%p3916_p0) target bundleno = 622 (0x26e), region = 56  ;;  %v2921_v39 = vsel (!%p3916_p0), %vm2920_vm5, %v6084_v36, 0.0  ;;  %v2922_v22 = vsel (!%p3916_p0), %vm2920_vm5, %v6096_v58, 0.0  ;;  %v2924_v51 = vsel (!%p3916_p0), %vm2920_vm5, %v6081_v60, 0.0  ;;  %v2926_v41 = vsel (!%p3916_p0), %vm2920_vm5, %v6093_v61, 0.0 }
 0x219   : > { %v2923_v63 = vadd.f32 (!%p3916_p0), %v2922_v22, %v2921_v39  ;;  %v2928_v16 = vsel (!%p3916_p0), %vm2920_vm5, %v6109_v53, 0.0  ;;  %v2930_v15 = vsel (!%p3916_p0), %vm2920_vm5, %v6121_v48, 0.0  ;;  %v2932_v44 = vsel (!%p3916_p0), %vm2920_vm5, %v6106_v27, 0.0 }
 0x21a   : > { %v2934_v54 = vsel (!%p3916_p0), %vm2920_vm5, %v6118_v18, 0.0  ;;  %v2936_v31 = vsel (!%p3916_p0), %vm2920_vm5, %v6137_v35, 0.0  ;;  %v2938_v30 = vsel (!%p3916_p0), %vm2920_vm5, %v6149_v19, 0.0  ;;  %v2940_v20 = vsel (!%p3916_p0), %vm2920_vm5, %v6134_v49, 0.0 }
 0x21b   : > { %v2925_v46 = vadd.f32 (!%p3916_p0), %v2924_v51, %v2923_v63  ;;  %v2997_v5 = vmul.f32 (!%p3916_p0), %v6093_v61, %v6093_v61  ;;  %v3026_v26 = vsel (!%p3916_p0), %vm2920_vm5, %v2994_v52, 0.0  ;;  %v2942_v7 = vsel (!%p3916_p0), %vm2920_vm5, %v6146_v3, 0.0 }
 0x21c   : > { %v2998_v25 = vmul.f32 (!%p3916_p0), %v6109_v53, %v6109_v53  ;;  %v3027_v43 = vsel (!%p3916_p0), %vm2920_vm5, %v2995_v37, 0.0  ;;  %v3029_v45 = vsel (!%p3916_p0), %vm2920_vm5, %v2996_v1, 0.0  ;;  %v2944_v14 = vsel (!%p3916_p0), %vm2920_vm5, %v6165_v55, 0.0 }
 0x21d   : > { %v2927_v28 = vadd.f32 (!%p3916_p0), %v2926_v41, %v2925_v46  ;;  %v3028_v42 = vadd.f32 (!%p3916_p0), %v3027_v43, %v3026_v26  ;;  %v2999_v39 = vmul.f32 (!%p3916_p0), %v6121_v48, %v6121_v48  ;;  %v3031_v22 = vsel (!%p3916_p0), %vm2920_vm5, %v2997_v5, 0.0 }
 0x21e   : > { %v2946_v41 = vsel (!%p3916_p0), %vm2920_vm5, %v6177_v2, 0.0  ;;  %v3000_v46 = vmul.f32 (!%p3916_p0), %v6106_v27, %v6106_v27  ;;  %v2952_v1 = vsel (!%p3916_p0), %vm2920_vm5, %v6193_v6, 0.0  ;;  %v2954_v26 = vsel (!%p3916_p0), %vm2920_vm5, %v6201_v12, 0.0 }
 0x21f   : > { %v2929_v21 = vadd.f32 %v2928_v16, %v2927_v28  ;;  %v3030_v63 = vadd.f32 %v3029_v45, %v3028_v42  ;;  %v3033_v16 = vsel %vm2920_vm5, %v2998_v25, 0.0  ;;  %v3005_v42 = vmul.f32 %v6146_v3, %v6146_v3 }
 0x220   : > { %v3037_v52 = vsel %vm2920_vm5, %v3000_v46, 0.0  ;;  %vm2991_vm6 = vcmask 57344  }
 0x221   : > { %v2931_v50 = vadd.f32 %v2930_v15, %v2929_v21  ;;  %v3032_v15 = vadd.f32 %v3031_v22, %v3030_v63  ;;  %v2948_v21 = vsel %vm2920_vm5, %v6162_v10, 0.0  ;;  %v3006_v63 = vmul.f32 %v6165_v55, %v6165_v55 }
 0x223   : > { %v2933_v0 = vadd.f32 %v2932_v44, %v2931_v50  ;;  %v3001_v44 = vmul.f32 %v6118_v18, %v6118_v18  ;;  %v3035_v50 = vsel %vm2920_vm5, %v2999_v39, 0.0 }
 0x225   : > { %v2935_v47 = vadd.f32 %v2934_v54, %v2933_v0  ;;  %v3034_v0 = vadd.f32 %v3033_v16, %v3032_v15  ;;  %v3007_v15 = vmul.f32 %v6177_v2, %v6177_v2 }
 0x227   : > { %v2937_v8 = vadd.f32 %v2936_v31, %v2935_v47  ;;  %v2950_v31 = vsel %vm2920_vm5, %v6174_v62, 0.0  ;;  %v3002_v47 = vmul.f32 %v6137_v35, %v6137_v35  ;;  %v3036_v37 = vadd.f32 %v3035_v50, %v3034_v0 }
 0x228   : > { %v3008_v0 = vmul.f32 %v6162_v10, %v6162_v10 }
 0x229   : > { %v2939_v32 = vadd.f32 %v2938_v30, %v2937_v8  ;;  %v3003_v8 = vmul.f32 %v6149_v19, %v6149_v19  ;;  %v3041_v25 = vsel %vm2920_vm5, %v3002_v47, 0.0 }
 0x22b   : > { %v2941_v38 = vadd.f32 %v2940_v20, %v2939_v32  ;;  %v3039_v20 = vsel %vm2920_vm5, %v3001_v44, 0.0  ;;  %v3038_v32 = vadd.f32 %v3037_v52, %v3036_v37  ;;  %v3009_v37 = vmul.f32 %v6174_v62, %v6174_v62 }
 0x22d   : > { %v2943_v51 = vadd.f32 %v2942_v7, %v2941_v38  ;;  %v3004_v7 = vmul.f32 %v6134_v49, %v6134_v49  ;;  %v3040_v45 = vadd.f32 %v3039_v20, %v3038_v32  ;;  %v2956_v38 = vsel %vm2920_vm5, %v6190_v56, 0.0 }
 0x22e   : > { %v3010_v32 = vmul.f32 %v6193_v6, %v6193_v6 }
 0x22f   : > { %v2945_v28 = vadd.f32 %v2944_v14, %v2943_v51  ;;  %v3043_v14 = vsel %vm2920_vm5, %v3003_v8, 0.0  ;;  %v3042_v22 = vadd.f32 %v3041_v25, %v3040_v45  ;;  %v2958_v51 = vsel %vm2920_vm5, %v6198_v29, 0.0 }
 0x230   : > { %v3011_v45 = vmul.f32 %v6201_v12, %v6201_v12 }
 0x231   : > { %v2947_v54 = vadd.f32 %v2946_v41, %v2945_v28  ;;  %v3045_v41 = vsel %vm2920_vm5, %v3004_v7, 0.0  ;;  %v3044_v16 = vadd.f32 %v3043_v14, %v3042_v22  ;;  %v2960_v28 = vsel %vm2920_vm5, %v6217_v24, 0.0 }
 0x232   : > { %v3012_v22 = vmul.f32 %v6190_v56, %v6190_v56 }
 0x233   : > { %v2949_v30 = vadd.f32 %v2948_v21, %v2947_v54  ;;  %v3047_v21 = vsel %vm2920_vm5, %v3005_v42, 0.0  ;;  %v3046_v50 = vadd.f32 %v3045_v41, %v3044_v16  ;;  %v2962_v54 = vsel %vm2920_vm5, %v6225_v33, 0.0 }
 0x234   : > { %v3013_v16 = vmul.f32 %v6198_v29, %v6198_v29 }
 0x235   : > { %v2951_v5 = vadd.f32 %v2950_v31, %v2949_v30  ;;  %v3049_v31 = vsel %vm2920_vm5, %v3006_v63, 0.0  ;;  %v3048_v52 = vadd.f32 %v3047_v21, %v3046_v50  ;;  %v2964_v30 = vsel %vm2920_vm5, %v6214_v59, 0.0 }
 0x236   : > { %v3014_v50 = vmul.f32 %v6217_v24, %v6217_v24 }
 0x237   : > { %v2953_v43 = vadd.f32 %v2952_v1, %v2951_v5  ;;  %v3051_v1 = vsel %vm2920_vm5, %v3007_v15, 0.0  ;;  %v3050_v20 = vadd.f32 %v3049_v31, %v3048_v52  ;;  %v2966_v5 = vsel %vm2920_vm5, %v6222_v9, 0.0 }
 0x238   : > { %v3015_v52 = vmul.f32 %v6225_v33, %v6225_v33 }
 0x239   : > { %v2955_v39 = vadd.f32 %v2954_v26, %v2953_v43  ;;  %v3053_v26 = vsel %vm2920_vm5, %v3008_v0, 0.0  ;;  %v3052_v25 = vadd.f32 %v3051_v1, %v3050_v20  ;;  %v2968_v43 = vsel %vm2920_vm5, %v6239_v40, 0.0 }
 0x23a   : > { %v3016_v20 = vmul.f32 %v6214_v59, %v6214_v59 }
 0x23b   : > { %v2957_v46 = vadd.f32 %v2956_v38, %v2955_v39  ;;  %v3055_v38 = vsel %vm2920_vm5, %v3009_v37, 0.0  ;;  %v3054_v14 = vadd.f32 %v3053_v26, %v3052_v25  ;;  %v2970_v39 = vsel %vm2920_vm5, %v6247_v34, 0.0 }
 0x23c   : > { %v3017_v25 = vmul.f32 %v6222_v9, %v6222_v9 }
 0x23d   : > { %v2959_v44 = vadd.f32 %v2958_v51, %v2957_v46  ;;  %v3057_v51 = vsel %vm2920_vm5, %v3010_v32, 0.0  ;;  %v3056_v41 = vadd.f32 %v3055_v38, %v3054_v14  ;;  %v2972_v46 = vsel %vm2920_vm5, %v6236_v4, 0.0 }
 0x23e   : > { %v3018_v14 = vmul.f32 %v6239_v40, %v6239_v40 }
 0x23f   : > { %v2961_v47 = vadd.f32 %v2960_v28, %v2959_v44  ;;  %v3059_v28 = vsel %vm2920_vm5, %v3011_v45, 0.0  ;;  %v3058_v21 = vadd.f32 %v3057_v51, %v3056_v41  ;;  %v2974_v44 = vsel %vm2920_vm5, %v6244_v13, 0.0 }
 0x240   : > { %v3071_v41 = vsel %vm2920_vm5, %v3017_v25, 0.0 }
 0x241   : > { %v2963_v8 = vadd.f32 %v2962_v54, %v2961_v47  ;;  %v3061_v54 = vsel %vm2920_vm5, %v3012_v22, 0.0  ;;  %v3060_v31 = vadd.f32 %v3059_v28, %v3058_v21  ;;  %v2976_v47 = vsel %vm2920_vm5, %v6257_v17, 0.0 }
 0x242   : > { %v3020_v28 = vmul.f32 %v6236_v4, %v6236_v4 }
 0x243   : > { %v2965_v7 = vadd.f32 %v2964_v30, %v2963_v8  ;;  %v3063_v30 = vsel %vm2920_vm5, %v3013_v16, 0.0  ;;  %v3062_v1 = vadd.f32 %v3061_v54, %v3060_v31  ;;  %v2978_v8 = vsel %vm2920_vm5, %v6263_v11, 0.0 }
 0x245   : > { %v2967_v42 = vadd.f32 %v2966_v5, %v2965_v7  ;;  %v3065_v5 = vsel %vm2920_vm5, %v3014_v50, 0.0  ;;  %v3064_v26 = vadd.f32 %v3063_v30, %v3062_v1  ;;  %v2980_v7 = vsel %vm2920_vm5, %v6254_v57, 0.0 }
 0x246   : > { %v3021_v50 = vmul.f32 %v6244_v13, %v6244_v13  ;;  %v3023_v1 = vmul.f32 %v6263_v11, %v6263_v11 }
 0x247   : > { %v2969_v63 = vadd.f32 %v2968_v43, %v2967_v42  ;;  %v3067_v43 = vsel %vm2920_vm5, %v3015_v52, 0.0  ;;  %v3066_v38 = vadd.f32 %v3065_v5, %v3064_v26  ;;  %v2982_v42 = vsel %vm2920_vm5, %v6260_v23, 0.0 }
 0x248   : > { %v3077_v52 = vsel %vm2920_vm5, %v3020_v28, 0.0 }
 0x249   : > { %v2971_v15 = vadd.f32 %v2970_v39, %v2969_v63  ;;  %v3069_v39 = vsel %vm2920_vm5, %v3016_v20, 0.0  ;;  %v3068_v51 = vadd.f32 %v3067_v43, %v3066_v38  ;;  %v3019_v63 = vmul.f32 %v6247_v34, %v6247_v34  ;;  %v2919_v43 = vld [vmem:[#allocation2] sm:$0x1] }
 0x24a   : > { %v3083_v38 = vsel %vm2920_vm5, %v3023_v1, 0.0 }
 0x24b   : > { %v2973_v0 = vadd.f32 %v2972_v46, %v2971_v15  ;;  %v3070_v16 = vadd.f32 %v3069_v39, %v3068_v51  ;;  %v3073_v15 = vsel %vm2920_vm5, %v3018_v14, 0.0  ;;  %v3075_v54 = vsel %vm2920_vm5, %v3019_v63, 0.0 }
 0x24d   : > { %v2975_v37 = vadd.f32 %v2974_v44, %v2973_v0  ;;  %v3072_v44 = vadd.f32 %v3071_v41, %v3070_v16 }
 0x24f   : > { %v2977_v32 = vadd.f32 %v2976_v47, %v2975_v37  ;;  %v3074_v31 = vadd.f32 %v3073_v15, %v3072_v44  ;;  %v3022_v47 = vmul.f32 %v6257_v17, %v6257_v17 }
 0x251   : > { %v2979_v45 = vadd.f32 %v2978_v8, %v2977_v32  ;;  %v3076_v37 = vadd.f32 %v3075_v54, %v3074_v31  ;;  %v3079_v8 = vsel %vm2920_vm5, %v3021_v50, 0.0  ;;  %v3024_v32 = vmul.f32 %v6254_v57, %v6254_v57  ;;  %v2993_v50 = vld [vmem:[#allocation3] sm:$0x1] }
 0x252   : > { %v3081_v26 = vsel %vm2920_vm5, %v3022_v47, 0.0 }
 0x253   : > { %v2981_v22 = vadd.f32 %v2980_v7, %v2979_v45  ;;  %v3078_v5 = vadd.f32 %v3077_v52, %v3076_v37  ;;  %v3025_v45 = vmul.f32 %v6260_v23, %v6260_v23  ;;  %v3085_v39 = vsel %vm2920_vm5, %v3024_v32, 0.0 }
 0x255   : > { %v2983_v46 = vadd.f32 %v2982_v42, %v2981_v22  ;;  %v3080_v25 = vadd.f32 %v3079_v8, %v3078_v5  ;;  %v3087_v63 = vsel %vm2920_vm5, %v3025_v45, 0.0 }
 0x257   : > { %v2984_v21 = vrot.slane %v2983_v46, 4  ;;  %v3082_v14 = vadd.f32 %v3081_v26, %v3080_v25 }
 0x259   : > { %v2985_v0 = vadd.f32 %v2984_v21, %v2983_v46  ;;  %v3084_v51 = vadd.f32 %v3083_v38, %v3082_v14 }
 0x25b   : > { %v2986_v30 = vrot.slane %v2985_v0, 2  ;;  %v3086_v41 = vadd.f32 %v3085_v39, %v3084_v51 }
 0x25d   : > { %v2987_v20 = vadd.f32 %v2986_v30, %v2985_v0  ;;  %v3088_v46 = vadd.f32 %v3087_v63, %v3086_v41 }
 0x25f   : > { %v2988_v7 = vrot.slane %v2987_v20, 1  ;;  %v3089_v16 = vrot.slane %v3088_v46, 4 }
 0x261   : > { %v2989_v42 = vadd.f32 %v2988_v7, %v2987_v20  ;;  %v3090_v28 = vadd.f32 %v3089_v16, %v3088_v46 }
 0x263   : > { %v2990_v22 = vadd.f32 %v2989_v42, %v2919_v43  ;;  %v3091_v15 = vrot.slane %v3090_v28, 2 }
 0x265   : > { %2992 = vst.msk [vmem:[#allocation2] sm:$0x1] %vm2991_vm6, %v2990_v22  ;;  %v3092_v21 = vadd.f32 %v3091_v15, %v3090_v28 }
 0x267   : > { %v3093_v44 = vrot.slane %v3092_v21, 1 }
 0x269   : > { %v3094_v54 = vadd.f32 %v3093_v44, %v3092_v21 }
 0x26b   : > { %v3095_v0 = vadd.f32 %v3094_v54, %v2993_v50 }
 0x26d   : > { %3096 = vst.msk [vmem:[#allocation3] sm:$0x1] %vm2991_vm6, %v3095_v0 }
 0x26e PF: > { %p3097_p1 = scmp.eq.s32.totalorder %s4950_s27, 1 }
 0x26f   : > { %v3103_v31 = vld [vmem:[%s6733_s5] sm:$0xff] (%p3097_p1)  ;;  %vm3104_vm7 = vcmask (%p3097_p1), 64512   ;;  %v4971_v52 = vmov (%p3097_p1), 0.0   ;;  %vm4972_vm8 = vmmov (%p3097_p1), 0   ;;  %vm3261_vm9 = vcmask (%p3097_p1), 57344  }
 0x270   : > { %3101 = sbr.rel (!%p3097_p1) target bundleno = 865 (0x361), region = 60  ;;  %v3102_v47 = vld [vmem:[#allocation2] sm:$0x1] (%p3097_p1)  ;;  %4426 = vmatprep.subr.mxu0 (%p3097_p1), %v4971_v52  ;;  %4428 = vmatprep.mubr.msk.f32.mxu0 (%p3097_p1), %vm4972_vm8, %v4971_v52 }
 0x271   : > { %4427 = vmatpush3.msra.mxu0 (%p3097_p1), %v3103_v31  ;;  %4431 = vmatprep.subr.mxu1 (%p3097_p1), %v4971_v52  ;;  %v3259_v43 = vld [vmem:[%s6731_s3] sm:$0x1] (%p3097_p1) }
 0x272   : > { %4429 = vmatmul.mubr.msk.f32.vlgmr.msra.gmra.mrb[0].mxu0 (%p3097_p1), %vm3104_vm7, %v3102_v47  ;;  %4432 = vmatpush3.msra.mxu1 (%p3097_p1), %v3103_v31  ;;  %v3263_v42 = vld [vmem:[%s6732_s4] sm:$0x1] (%p3097_p1) }
 0x273   : > { %4433 = vmatprep.mubr.msk.f32.mxu1 (%p3097_p1), %vm4972_vm8, %v4971_v52 }
 0x274   : > { %v3178_v30 = vld [vmem:[#allocation3] sm:$0x1] (%p3097_p1) }
 0x275   : > { %4434 = vmatmul.mubr.msk.f32.vlgmr.msra.gmra.mrb[0].mxu1 (%p3097_p1), %vm3104_vm7, %v3178_v30 }
 0x345   : > { %v3174_v37 = vpop.f32.mrb[0].mxu0 }
 0x346   : > { %v3253_v1 = vmul.f32 0.00390625, %v3174_v37  ;;  %v4430_v8 = vpop.f32.mrb[1].mxu0 }
 0x348   : > { %v3248_v20 = vpop.f32.mrb[0].mxu1  ;;  %v3255_v5 = vmul.f32 %v3253_v1, %v3253_v1 }
 0x349   : > { %v3254_v32 = vmul.f32 0.00390625, %v3248_v20  ;;  %v4435_v26 = vpop.f32.mrb[1].mxu1 }
 0x34b   : > { %v3256_v7 = vsub.f32 %v3254_v32, %v3255_v5 }
 0x34d   : > { %v3257_v25 = vadd.f32 1e-05, %v3256_v7 }
 0x34f   : > { %4742 = vrsqrt.f32 %v3257_v25 }
 0x359   : > { %v4743_v45 = vpop.eup %4742 }
 0x35a   : > { %v3260_v38 = vmul.f32 %v4743_v45, %v3259_v43 }
 0x35c   : > { %3262 = vst.msk [vmem:[#allocation4] sm:$0x1] %vm3261_vm9, %v3260_v38  ;;  %v3264_v14 = vmul.f32 %v3260_v38, %v3253_v1 }
 0x35e   : > { %v3265_v39 = vsub.f32 %v3263_v42, %v3264_v14 }
 0x360   : > { %3266 = vst.msk [vmem:[#allocation5] sm:$0x1] %vm3261_vm9, %v3265_v39 }
 0x361 PF: > { %p3920_p2 = scmp.ne.s32.totalorder %s4950_s27, 1 }
 0x363   : > { %3269 = sbr.rel (%p3920_p2) target bundleno = 1034 (0x40a), region = 64  ;;  %v6444_v22 = vld [vmem:[#allocation4] ss:$0 sm:$0xff] (!%p3920_p2) }
 0x364   : > { %v3293_v63 = vmul.f32 (!%p3920_p2), %v6444_v22, %v6193_v6  ;;  %v3277_v41 = vmul.f32 (!%p3920_p2), %v6444_v22, %v6084_v36  ;;  %v3294_v46 = vmul.f32 (!%p3920_p2), %v6444_v22, %v6201_v12  ;;  %v3278_v16 = vmul.f32 (!%p3920_p2), %v6444_v22, %v6096_v58 }
 0x365   : > { %v3295_v28 = vmul.f32 (!%p3920_p2), %v6444_v22, %v6190_v56  ;;  %v3279_v15 = vmul.f32 (!%p3920_p2), %v6444_v22, %v6081_v60  ;;  %v3296_v21 = vmul.f32 (!%p3920_p2), %v6444_v22, %v6198_v29  ;;  %v3280_v6 = vmul.f32 (!%p3920_p2), %v6444_v22, %v6093_v61 }
 0x366   : > { %v3297_v0 = vmul.f32 (!%p3920_p2), %v6444_v22, %v6217_v24  ;;  %v3281_v52 = vmul.f32 (!%p3920_p2), %v6444_v22, %v6109_v53  ;;  %v3298_v24 = vmul.f32 (!%p3920_p2), %v6444_v22, %v6225_v33  ;;  %v3282_v20 = vmul.f32 (!%p3920_p2), %v6444_v22, %v6121_v48 }
 0x367   : > { %v6446_v51 = vld [vmem:[#allocation5] ss:$0 sm:$0xff] (!%p3920_p2)  ;;  %v3299_v5 = vmul.f32 (!%p3920_p2), %v6444_v22, %v6214_v59  ;;  %v3283_v42 = vmul.f32 (!%p3920_p2), %v6444_v22, %v6106_v27 }
 0x368   : > { %v6465_v36 = vadd.f32 (!%p3920_p2), %v6446_v51, %v3293_v63  ;;  %v6468_v12 = vadd.f32 (!%p3920_p2), %v6446_v51, %v3277_v41  ;;  %v6471_v58 = vadd.f32 (!%p3920_p2), %v6446_v51, %v3294_v46  ;;  %v6474_v56 = vadd.f32 (!%p3920_p2), %v6446_v51, %v3278_v16 }
 0x369   : > { %v6477_v60 = vadd.f32 (!%p3920_p2), %v6446_v51, %v3295_v28  ;;  %v6480_v29 = vadd.f32 (!%p3920_p2), %v6446_v51, %v3279_v15  ;;  %v6483_v61 = vadd.f32 (!%p3920_p2), %v6446_v51, %v3296_v21  ;;  %v6492_v47 = vadd.f32 (!%p3920_p2), %v6446_v51, %v3280_v6 }
 0x36a   : > { %v3939_v44 = vmul.f32 -1.442695, %v6465_v36  ;;  %v3923_v50 = vmul.f32 -1.442695, %v6468_v12  ;;  %v3940_v54 = vmul.f32 -1.442695, %v6471_v58  ;;  %v6499_v1 = vadd.f32 %v6446_v51, %v3297_v0 }
 0x36b   : > { %v3924_v31 = vmul.f32 -1.442695, %v6474_v56  ;;  %v3941_v30 = vmul.f32 -1.442695, %v6477_v60  ;;  %v3925_v37 = vmul.f32 -1.442695, %v6480_v29  ;;  %v6502_v8 = vadd.f32 %v6446_v51, %v3281_v52 }
 0x36c   : > { %4744 = vpow2.f32 %v3939_v44  ;;  %v3942_v53 = vmul.f32 -1.442695, %v6483_v61  ;;  %v3926_v32 = vmul.f32 -1.442695, %v6492_v47  ;;  %v6513_v26 = vadd.f32 %v6446_v51, %v3298_v24 }
 0x36d   : > { %4746 = vpow2.f32 %v3923_v50  ;;  %v6516_v7 = vadd.f32 %v6446_v51, %v3282_v20  ;;  %v3943_v33 = vmul.f32 -1.442695, %v6499_v1  ;;  %v6520_v48 = vadd.f32 %v6446_v51, %v3299_v5 }
 0x36e   : > { %4748 = vpow2.f32 %v3940_v54  ;;  %v3927_v25 = vmul.f32 -1.442695, %v6502_v8  ;;  %v3944_v59 = vmul.f32 -1.442695, %v6513_v26  ;;  %v3300_v63 = vmul.f32 %v6444_v22, %v6222_v9 }
 0x36f   : > { %4750 = vpow2.f32 %v3924_v31  ;;  %v3928_v43 = vmul.f32 -1.442695, %v6516_v7  ;;  %v3945_v45 = vmul.f32 -1.442695, %v6520_v48  ;;  %v3284_v16 = vmul.f32 %v6444_v22, %v6118_v18 }
 0x370   : > { %4752 = vpow2.f32 %v3941_v30  ;;  %v6533_v27 = vadd.f32 %v6446_v51, %v3283_v42  ;;  %v6536_v9 = vadd.f32 %v6446_v51, %v3300_v63  ;;  %v3301_v54 = vmul.f32 %v6444_v22, %v6239_v40 }
 0x371   : > { %4754 = vpow2.f32 %v3925_v37  ;;  %v6541_v31 = vadd.f32 %v6446_v51, %v3284_v16  ;;  %v3285_v52 = vmul.f32 %v6444_v22, %v6137_v35  ;;  %v3302_v24 = vmul.f32 %v6444_v22, %v6247_v34 }
 0x372   : > { %4756 = vpow2.f32 %v3942_v53  ;;  %v3929_v40 = vmul.f32 -1.442695, %v6533_v27  ;;  %v3286_v5 = vmul.f32 %v6444_v22, %v6149_v19  ;;  %v6552_v35 = vadd.f32 %v6446_v51, %v3301_v54 }
 0x373   : > { %4758 = vpow2.f32 %v3926_v32  ;;  %v3930_v34 = vmul.f32 -1.442695, %v6541_v31  ;;  %v6559_v19 = vadd.f32 %v6446_v51, %v3302_v24 }
 0x374   : > { %4760 = vpow2.f32 %v3943_v33 }
 0x375   : > { %4762 = vpow2.f32 %v3927_v25  ;;  %v3946_v25 = vmul.f32 -1.442695, %v6536_v9 }
 0x376   : > { %v4745_v38 = vpop.eup %4744  ;;  %4764 = vpow2.f32 %v3944_v59 }
 0x377   : > { %v4747_v14 = vpop.eup %4746  ;;  %v3460_v39 = vadd.f32 1.0, %v4745_v38  ;;  %4766 = vpow2.f32 %v3928_v43 }
 0x378   : > { %v4749_v41 = vpop.eup %4748  ;;  %v3444_v46 = vadd.f32 1.0, %v4747_v14  ;;  %4768 = vpow2.f32 %v3945_v45  ;;  %v6556_v45 = vadd.f32 %v6446_v51, %v3285_v52  ;;  %v3303_v14 = vmul.f32 %v6444_v22, %v6236_v4 }
 0x379   : > { %v4751_v28 = vpop.eup %4750  ;;  %4770 = vrcp.f32 %v3460_v39  ;;  %v3461_v15 = vadd.f32 1.0, %v4749_v41  ;;  %v6564_v41 = vadd.f32 %v6446_v51, %v3286_v5 }
 0x37a   : > { %v4753_v21 = vpop.eup %4752  ;;  %4772 = vrcp.f32 %v3444_v46  ;;  %v3445_v6 = vadd.f32 1.0, %v4751_v28  ;;  %v3287_v46 = vmul.f32 %v6444_v22, %v6134_v49 }
 0x37b   : > { %v4755_v44 = vpop.eup %4754  ;;  %4774 = vrcp.f32 %v3461_v15  ;;  %v3462_v50 = vadd.f32 1.0, %v4753_v21  ;;  %v3947_v15 = vmul.f32 -1.442695, %v6552_v35  ;;  %v3304_v21 = vmul.f32 %v6444_v22, %v6244_v13 }
 0x37c   : > { %v4757_v0 = vpop.eup %4756  ;;  %4776 = vrcp.f32 %v3445_v6  ;;  %v3446_v18 = vadd.f32 1.0, %v4755_v44  ;;  %v3931_v44 = vmul.f32 -1.442695, %v6556_v45  ;;  %v6583_v52 = vadd.f32 %v6446_v51, %v3287_v46 }
 0x37d   : > { %v4759_v30 = vpop.eup %4758  ;;  %4778 = vrcp.f32 %v3462_v50  ;;  %v3463_v37 = vadd.f32 1.0, %v4757_v0  ;;  %v3288_v50 = vmul.f32 %v6444_v22, %v6146_v3  ;;  %v6577_v0 = vadd.f32 %v6446_v51, %v3303_v14 }
 0x37e   : > { %v4761_v20 = vpop.eup %4760  ;;  %4780 = vrcp.f32 %v3446_v18  ;;  %v3447_v53 = vadd.f32 1.0, %v4759_v30  ;;  %v3305_v18 = vmul.f32 %v6444_v22, %v6257_v17  ;;  %v3289_v3 = vmul.f32 %v6444_v22, %v6165_v55 }
 0x37f   : > { %v4763_v32 = vpop.eup %4762  ;;  %4782 = vrcp.f32 %v3463_v37  ;;  %v3464_v33 = vadd.f32 1.0, %v4761_v20  ;;  %v3948_v37 = vmul.f32 -1.442695, %v6559_v19  ;;  %v6590_v17 = vadd.f32 %v6446_v51, %v3304_v21 }
 0x380   : > { %v4765_v59 = vpop.eup %4764  ;;  %4784 = vrcp.f32 %v3447_v53  ;;  %v3448_v43 = vadd.f32 1.0, %v4763_v32  ;;  %v6594_v20 = vadd.f32 %v6446_v51, %v3288_v50  ;;  %v3949_v55 = vmul.f32 -1.442695, %v6577_v0 }
 0x381   : > { %v4767_v38 = vpop.eup %4766  ;;  %4786 = vrcp.f32 %v3464_v33  ;;  %v3465_v42 = vadd.f32 1.0, %v4765_v59  ;;  %v3933_v32 = vmul.f32 -1.442695, %v6583_v52  ;;  %v6603_v33 = vadd.f32 %v6446_v51, %v3289_v3 }
 0x382   : > { %v4769_v39 = vpop.eup %4768  ;;  %4788 = vrcp.f32 %v3448_v43  ;;  %v3449_v63 = vadd.f32 1.0, %v4767_v38  ;;  %v3950_v43 = vmul.f32 -1.442695, %v6590_v17  ;;  %v3934_v38 = vmul.f32 -1.442695, %v6594_v20 }
 0x383   : > { %v4771_v16 = vpop.eup %4770  ;;  %4790 = vrcp.f32 %v3465_v42  ;;  %v3466_v28 = vadd.f32 1.0, %v4769_v39 }
 0x384   : > { %v4773_v6 = vpop.eup %4772  ;;  %v3556_v4 = vmul.f32 %v4771_v16, %v6465_v36  ;;  %4792 = vrcp.f32 %v3449_v63  ;;  %v3935_v63 = vmul.f32 -1.442695, %v6603_v33 }
 0x385   : > { %v4775_v54 = vpop.eup %4774  ;;  %v3540_v49 = vmul.f32 %v4773_v6, %v6468_v12  ;;  %4794 = vrcp.f32 %v3466_v28 }
 0x386   : > { %v4777_v13 = vpop.eup %4776  ;;  %3604 = vxpose.xlu1.b32.start [1/16] (narrow) %v3556_v4, 8  ;;  %v3557_v36 = vmul.f32 %v4775_v54, %v6471_v58  ;;  %4796 = vpow2.f32 %v3929_v40  ;;  %v3932_v58 = vmul.f32 -1.442695, %v6564_v41  ;;  %v6598_v40 = vadd.f32 %v6446_v51, %v3305_v18 }
 0x387   : > { %v4779_v30 = vpop.eup %4778  ;;  %3572 = vxpose.xlu0.b32.start [1/16] (narrow) %v3540_v49, 8  ;;  %v3541_v12 = vmul.f32 %v4777_v13, %v6474_v56  ;;  %4798 = vpow2.f32 %v3946_v25  ;;  %v3306_v49 = vmul.f32 %v6444_v22, %v6263_v11 }
 0x388   : > { %v4781_v24 = vpop.eup %4780  ;;  %4800 = vpow2.f32 %v3930_v34  ;;  %v3558_v5 = vmul.f32 %v4779_v30, %v6477_v60  ;;  %v3951_v60 = vmul.f32 -1.442695, %v6598_v40  ;;  %v3307_v30 = vmul.f32 %v6444_v22, %v6254_v57 }
 0x389   : > { %v4783_v53 = vpop.eup %4782  ;;  %4802 = vpow2.f32 %v3947_v15  ;;  %v3542_v59 = vmul.f32 %v4781_v24, %v6480_v29  ;;  %v3291_v24 = vmul.f32 %v6444_v22, %v6162_v10 }
 0x38a   : > { %v4785_v56 = vpop.eup %4784  ;;  %3605 = vxpose.xlu1.b32.cont [2/16] (narrow) %v3557_v36, 8  ;;  %4804 = vpow2.f32 %v3931_v44  ;;  %v3559_v39 = vmul.f32 %v4783_v53, %v6483_v61  ;;  %v6625_v53 = vadd.f32 %v6446_v51, %v3306_v49 }
 0x38b   : > { %v4787_v25 = vpop.eup %4786  ;;  %3573 = vxpose.xlu0.b32.cont [2/16] (narrow) %v3541_v12, 8  ;;  %4806 = vpow2.f32 %v3948_v37  ;;  %v3543_v29 = vmul.f32 %v4785_v56, %v6492_v47 }
 0x38c   : > { %v4789_v34 = vpop.eup %4788  ;;  %4808 = vpow2.f32 %v3932_v58  ;;  %v3560_v6 = vmul.f32 %v4787_v25, %v6499_v1  ;;  %v3290_v1 = vmul.f32 %v6444_v22, %v6177_v2  ;;  %v6636_v25 = vadd.f32 %v6446_v51, %v3307_v30 }
 0x38d   : > { %v4791_v42 = vpop.eup %4790  ;;  %4810 = vpow2.f32 %v3949_v55  ;;  %v3544_v44 = vmul.f32 %v4789_v34, %v6502_v8 }
 0x38e   : > { %v4793_v14 = vpop.eup %4792  ;;  %3606 = vxpose.xlu1.b32.cont [3/16] (narrow) %v3558_v5, 8  ;;  %4812 = vpow2.f32 %v3933_v32  ;;  %v3561_v3 = vmul.f32 %v4791_v42, %v6513_v26  ;;  %v3308_v26 = vmul.f32 %v6444_v22, %v6260_v23  ;;  %v6630_v56 = vadd.f32 %v6446_v51, %v3290_v1 }
 0x38f   : > { %v4795_v46 = vpop.eup %4794  ;;  %3574 = vxpose.xlu0.b32.cont [3/16] (narrow) %v3542_v59, 8  ;;  %4814 = vpow2.f32 %v3950_v43  ;;  %v3545_v37 = vmul.f32 %v4793_v14, %v6516_v7  ;;  %v3292_v7 = vmul.f32 %v6444_v22, %v6174_v62  ;;  %v6639_v43 = vadd.f32 %v6446_v51, %v3291_v24 }
 0x390   : > { %v4797_v16 = vpop.eup %4796  ;;  %4816 = vpow2.f32 %v3934_v38  ;;  %v3562_v10 = vmul.f32 %v4795_v46, %v6520_v48  ;;  %v3952_v62 = vmul.f32 -1.442695, %v6625_v53  ;;  %v6643_v22 = vadd.f32 %v6446_v51, %v3308_v26 }
 0x391   : > { %v4799_v28 = vpop.eup %4798  ;;  %v3450_v15 = vadd.f32 1.0, %v4797_v16  ;;  %4818 = vpow2.f32 %v3951_v60  ;;  %v3936_v42 = vmul.f32 -1.442695, %v6630_v56  ;;  %v6647_v60 = vadd.f32 %v6446_v51, %v3292_v7 }
 0x392   : > { %v4801_v21 = vpop.eup %4800  ;;  %3607 = vxpose.xlu1.b32.cont [4/16] (narrow) %v3559_v39, 8  ;;  %v3467_v4 = vadd.f32 1.0, %v4799_v28  ;;  %4820 = vpow2.f32 %v3935_v63  ;;  %v3953_v63 = vmul.f32 -1.442695, %v6636_v25  ;;  %v3937_v16 = vmul.f32 -1.442695, %v6639_v43 }
 0x393   : > { %v4803_v61 = vpop.eup %4802  ;;  %3575 = vxpose.xlu0.b32.cont [4/16] (narrow) %v3543_v29, 8  ;;  %4822 = vrcp.f32 %v3450_v15  ;;  %v3451_v50 = vadd.f32 1.0, %v4801_v21  ;;  %v3954_v51 = vmul.f32 -1.442695, %v6643_v22 }
 0x394   : > { %v4805_v54 = vpop.eup %4804  ;;  %4824 = vrcp.f32 %v3467_v4  ;;  %v3468_v47 = vadd.f32 1.0, %v4803_v61 }
 0x395   : > { %v4807_v18 = vpop.eup %4806  ;;  %4826 = vrcp.f32 %v3451_v50  ;;  %v3452_v13 = vadd.f32 1.0, %v4805_v54 }
 0x396   : > { %v4809_v36 = vpop.eup %4808  ;;  %3608 = vxpose.xlu1.b32.cont [5/16] (narrow) %v3560_v6, 8  ;;  %4828 = vrcp.f32 %v3468_v47  ;;  %v3469_v8 = vadd.f32 1.0, %v4807_v18 }
 0x397   : > { %v4811_v12 = vpop.eup %4810  ;;  %3576 = vxpose.xlu0.b32.cont [5/16] (narrow) %v3544_v44, 8  ;;  %4830 = vrcp.f32 %v3452_v13  ;;  %v3453_v11 = vadd.f32 1.0, %v4809_v36 }
 0x398   : > { %v4813_v58 = vpop.eup %4812  ;;  %v3470_v2 = vadd.f32 1.0, %v4811_v12  ;;  %4832 = vrcp.f32 %v3469_v8 }
 0x399   : > { %v4815_v55 = vpop.eup %4814  ;;  %v3454_v57 = vadd.f32 1.0, %v4813_v58  ;;  %4834 = vrcp.f32 %v3453_v11 }
 0x39a   : > { %v4817_v5 = vpop.eup %4816  ;;  %3609 = vxpose.xlu1.b32.cont [6/16] (narrow) %v3561_v3, 8  ;;  %v3471_v32 = vadd.f32 1.0, %v4815_v55  ;;  %4836 = vrcp.f32 %v3470_v2 }
 0x39b   : > { %v4819_v59 = vpop.eup %4818  ;;  %3577 = vxpose.xlu0.b32.cont [6/16] (narrow) %v3545_v37, 8  ;;  %v3455_v23 = vadd.f32 1.0, %v4817_v5  ;;  %4838 = vrcp.f32 %v3454_v57 }
 0x39c   : > { %v4821_v34 = vpop.eup %4820  ;;  %v3472_v38 = vadd.f32 1.0, %v4819_v59  ;;  %4840 = vrcp.f32 %v3471_v32 }
 0x39d   : > { %v4823_v48 = vpop.eup %4822  ;;  %4842 = vrcp.f32 %v3455_v23 }
 0x39e   : > { %v4825_v14 = vpop.eup %4824  ;;  %3610 = vxpose.xlu1.b32.cont [7/16] (narrow) %v3562_v10, 8  ;;  %v3546_v39 = vmul.f32 %v4823_v48, %v6533_v27  ;;  %4844 = vrcp.f32 %v3472_v38  ;;  %v3938_v27 = vmul.f32 -1.442695, %v6647_v60 }
 0x39f   : > { %v4827_v46 = vpop.eup %4826  ;;  %v3563_v29 = vmul.f32 %v4825_v14, %v6536_v9  ;;  %4846 = vpow2.f32 %v3952_v62  ;;  %v3456_v9 = vadd.f32 1.0, %v4821_v34 }
 0x3a0   : > { %v4829_v28 = vpop.eup %4828  ;;  %3578 = vxpose.xlu0.b32.cont [7/16] (narrow) %v3546_v39, 8  ;;  %v3547_v15 = vmul.f32 %v4827_v46, %v6541_v31  ;;  %4848 = vpow2.f32 %v3936_v42 }
 0x3a1   : > { %v4831_v21 = vpop.eup %4830  ;;  %v3564_v6 = vmul.f32 %v4829_v28, %v6552_v35  ;;  %4850 = vpow2.f32 %v3953_v63 }
 0x3a2   : > { %3611 = vxpose.xlu1.b32.cont [8/16] (narrow) %v3563_v29, 8  ;;  %v4833_v4 = vpop.eup %4832  ;;  %4852 = vpow2.f32 %v3937_v16  ;;  %v3548_v44 = vmul.f32 %v4831_v21, %v6556_v45 }
 0x3a3   : > { %v4835_v61 = vpop.eup %4834  ;;  %4854 = vpow2.f32 %v3954_v51  ;;  %v3565_v54 = vmul.f32 %v4833_v4, %v6559_v19 }
 0x3a4   : > { %3579 = vxpose.xlu0.b32.cont [8/16] (narrow) %v3547_v15, 8  ;;  %v4837_v31 = vpop.eup %4836  ;;  %4856 = vpow2.f32 %v3938_v27  ;;  %v3549_v35 = vmul.f32 %v4835_v61, %v6564_v41 }
 0x3a5   : > { %v4839_v50 = vpop.eup %4838  ;;  %4858 = vrcp.f32 %v3456_v9  ;;  %v3566_v1 = vmul.f32 %v4837_v31, %v6577_v0 }
 0x3a6   : > { %3612 = vxpose.xlu1.b32.cont [9/16] (narrow) %v3564_v6, 8  ;;  %v4841_v47 = vpop.eup %4840  ;;  %v3550_v8 = vmul.f32 %v4839_v50, %v6583_v52 }
 0x3a7   : > { %v4843_v49 = vpop.eup %4842  ;;  %v3567_v11 = vmul.f32 %v4841_v47, %v6590_v17 }
 0x3a8   : > { %3580 = vxpose.xlu0.b32.cont [9/16] (narrow) %v3548_v44, 8  ;;  %v4845_v18 = vpop.eup %4844  ;;  %v3551_v0 = vmul.f32 %v4843_v49, %v6594_v20 }
 0x3a9   : > { %v4847_v13 = vpop.eup %4846  ;;  %v3568_v52 = vmul.f32 %v4845_v18, %v6598_v40 }
 0x3aa   : > { %3613 = vxpose.xlu1.b32.cont [10/16] (narrow) %v3565_v54, 8  ;;  %v4849_v36 = vpop.eup %4848  ;;  %v3473_v45 = vadd.f32 1.0, %v4847_v13 }
 0x3ab   : > { %v4851_v3 = vpop.eup %4850  ;;  %v3457_v30 = vadd.f32 1.0, %v4849_v36 }
 0x3ac   : > { %3581 = vxpose.xlu0.b32.cont [10/16] (narrow) %v3549_v35, 8  ;;  %v4853_v12 = vpop.eup %4852  ;;  %4860 = vrcp.f32 %v3473_v45  ;;  %v3474_v19 = vadd.f32 1.0, %v4851_v3 }
 0x3ad   : > { %v4855_v37 = vpop.eup %4854  ;;  %4862 = vrcp.f32 %v3457_v30  ;;  %v3458_v41 = vadd.f32 1.0, %v4853_v12 }
 0x3ae   : > { %3614 = vxpose.xlu1.b32.cont [11/16] (narrow) %v3566_v1, 8  ;;  %v4857_v24 = vpop.eup %4856  ;;  %4864 = vrcp.f32 %v3474_v19  ;;  %v3475_v58 = vadd.f32 1.0, %v4855_v37 }
 0x3af   : > { %4866 = vrcp.f32 %v3458_v41  ;;  %v3459_v2 = vadd.f32 1.0, %v4857_v24  ;;  %v4859_v26 = vpop.eup %4858 }
 0x3b0   : > { %3582 = vxpose.xlu0.b32.cont [11/16] (narrow) %v3550_v8, 8  ;;  %4868 = vrcp.f32 %v3475_v58  ;;  %v3552_v55 = vmul.f32 %v4859_v26, %v6603_v33 }
 0x3b1   : > { %4870 = vrcp.f32 %v3459_v2 }
 0x3b2   : > { %3615 = vxpose.xlu1.b32.cont [12/16] (narrow) %v3567_v11, 8 }
 0x3b4   : > { %3583 = vxpose.xlu0.b32.cont [12/16] (narrow) %v3551_v0, 8 }
 0x3b6   : > { %3616 = vxpose.xlu1.b32.cont [13/16] (narrow) %v3568_v52, 8  ;;  %v4861_v17 = vpop.eup %4860 }
 0x3b7   : > { %v4863_v57 = vpop.eup %4862  ;;  %v3569_v7 = vmul.f32 %v4861_v17, %v6625_v53 }
 0x3b8   : > { %3584 = vxpose.xlu0.b32.cont [13/16] (narrow) %v3552_v55, 8  ;;  %v4865_v5 = vpop.eup %4864  ;;  %v3553_v20 = vmul.f32 %v4863_v57, %v6630_v56 }
 0x3b9   : > { %v4867_v10 = vpop.eup %4866  ;;  %v3570_v32 = vmul.f32 %v4865_v5, %v6636_v25 }
 0x3ba   : > { %3617 = vxpose.xlu1.b32.cont [14/16] (narrow) %v3569_v7, 8  ;;  %v4869_v40 = vpop.eup %4868  ;;  %v3554_v59 = vmul.f32 %v4867_v10, %v6639_v43 }
 0x3bb   : > { %v4871_v33 = vpop.eup %4870  ;;  %v3571_v23 = vmul.f32 %v4869_v40, %v6643_v22 }
 0x3bc   : > { %3585 = vxpose.xlu0.b32.cont [14/16] (narrow) %v3553_v20, 8  ;;  %v3555_v53 = vmul.f32 %v4871_v33, %v6647_v60 }
 0x3be   : > { %3618 = vxpose.xlu1.b32.cont [15/16] (narrow) %v3570_v32, 8 }
 0x3c0   : > { %3586 = vxpose.xlu0.b32.cont [15/16] (narrow) %v3554_v59, 8 }
 0x3c2   : > { %3619 = vxpose.xlu1.b32.end [16/16] (narrow) %v3571_v23, 8 }
 0x3c4   : > { %3587 = vxpose.xlu0.b32.end [16/16] (narrow) %v3555_v53, 8 }
 0x406   : > { %v3620_v34 = vpop.trf.xlu1 }
 0x407   : > { %3637 = vst [vmem:[%s6266_s10 + $0x8] sm:$0xff] %v3620_v34 }
 0x408   : > { %v3588_v56 = vpop.trf.xlu0 }
 0x409   : > { %3636 = vst [vmem:[%s6266_s10] sm:$0xff] %v3588_v56 }
 0x40a PF: > { %s3962_s27 = sshll.u32 %s4954_s28, 8  ;;  %s3656_s9 = sshll.u32 %s6266_s10, 4  ;;  %s3657_s9 = int_to_ptr.vmem [resolvable:$true] %s3656_s9 }
 0x40b   : > { %s6678_s20 = scalar_lea.hbm %s6735_s7, %s3962_s27  ;;  %s6853_s23 = sand.u32 1, %s4942_s25  }
 0x40c   : > { %s3639_s16 = scalar_lea.sflag [#allocation7], %s6853_s23  ;;  %s4872_s19 = scalar_lea.vmem %s3657_s9, 256 }
 0x40d   : > { %p4873_p4 = scmp.ne.s32.totalorder %s3657_s9, %s4872_s19  ;;  %s4973_s12 = smov [#allocation6]  }
 0x40e   : > { %s4876_s18 = sshll.u32 %s4973_s12, 4  ;;  %s4877_s18 = int_to_ptr.vmem [resolvable:$false] %s4876_s18 }
 0x40f   : > { %p4874_p5 = pnand %p4873_p4, %p5063_p3  ;;  %s4878_s15 = scalar_lea.vmem %s4877_s18, 512 }
 0x410   : > { %p4879_p7 = scmp.lt.s32.totalorder %s3657_s9, %s4877_s18  ;;  %p4880_p8 = scmp.lt.s32.totalorder %s4878_s15, %s4872_s19 }
 0x411   : > { %p4875_p6 = pneg %p4874_p5 }
 0x412   : > { %p4881_p10 = por %p4880_p8, %p4879_p7 }
 0x414   : > { %p4882_p11 = pnand %p4881_p10, %p4875_p6 }
 0x416   : > { %4885 = shalt.err (!%p4882_p11)
}
 0x417   : > { %s4886_s28 = scalar_lea.hbm %s6678_s20, 256  ;;  %s4890_s21 = scalar_lea.hbm %s6735_s7, 512 }
 0x418   : > { %p4887_p12 = scmp.ne.s32.totalorder %s6678_s20, %s4886_s28  ;;  %p4891_p1 = scmp.lt.u32.totalorder %s6678_s20, %s6735_s7 }
 0x419   : > { %p4892_p2 = scmp.lt.u32.totalorder %s4890_s21, %s4886_s28  ;;  %p4894_p5 = scmp.lt.u32.totalorder %s4886_s28, %s6678_s20 }
 0x41a   : > { %p4888_p13 = pnand %p4887_p12, %p5063_p3 }
 0x41b   : > { %p4893_p4 = por %p4892_p2, %p4891_p1 }
 0x41c   : > { %p4889_p0 = pneg %p4888_p13 }
 0x41d   : > { %p4895_p6 = por %p4894_p5, %p4893_p4 }
 0x41f   : > { %p4896_p7 = pnand %p4895_p6, %p4889_p0 }
 0x421   : > { %4899 = shalt.err (!%p4896_p7)
}
 0x422   : > { %4641 = dma.vmem_to_hbm [thread:$0]  (%p5063_p3), %s3657_s9, 256, %s6678_s20, %s3639_s16  }
 0x423 PF: > { %p4647_p8 = scmp.ge.s32.totalorder %s4966_s8, 2  ;;  %s3668_s19 = sand.u32 1, %s4938_s24  }
 0x424   : > { %s3669_s12 = scalar_lea.sflag [#allocation7], %s3668_s19 }
 0x425   : > { %p4644_p10 = pnand %p4647_p8, %p5073_p9 }
 0x427   : > { %4933 = dma.done.wait (!%p4644_p10), %s3669_s12, 256  }
 0x428   : > { %4935 = vsyncadd (!%p4644_p10), %s3669_s12, 4294967040  ;;  %s20_s8 = sadd.s32 1, %s4966_s8   ;;  %s6854_s13 = sld [smem:[#allocation9_spill]] }
 0x429   : > { %p17_p11 = scmp.ge.s32.totalorder %s20_s8, 6   ;;  %s6855_s24 = smov %s4942_s25 }
 0x42a   : > { %s6856_s25 = smov %s4946_s26  ;;  %s6857_s26 = smov %s5081_s17 }
 0x42b   : > { %s6858_s27 = smov %s4958_s29  ;;  %s6859_s28 = smov %s4962_s30 }
 0x42c   : > { %s6860_s29 = smov %s6863_s11  ;;  %19 = sbr.rel (!%p17_p11) target bundleno = 5 (0x5), region = 108 }
 0x42e   : > { %s6861_s30 = smov %s6854_s13 }
 0x433   :  { %3674 = vsyncpa [#allocation7], 1 }
 0x434   :  { %3676 = vsyncpa [#allocation7 + $0x1], 1 }

</bundles_post_ra>
